<compile_context>
chip_gen: v5e
topology: v5e:2x2
jax: 0.10.0
libtpu: 0.0.40
codegen_flags: <defaults>
</compile_context>

<pallas_src>
import functools

import numpy as np
import jax
import jax.numpy as jnp
from jax.experimental import pallas as pl
from jax.experimental.pallas import tpu as pltpu


# ---------------------------------------------------------------------------
# Encoder: both directions of the bidirectional LSTM in ONE kernel, with an
# in-kernel fori_loop over source time steps.  Packed-sequence semantics of
# pack_padded_sequence/pad_packed_sequence are reproduced with a precomputed
# per-step mask: state updates and outputs are masked out for t >= src_len[b].
# ---------------------------------------------------------------------------
def _encoder_kernel(x_ref, mask_ref, wf_ref, wb_ref, bf_ref, bb_ref,
                    outf_ref, outb_ref, lcf_ref, lcb_ref,
                    hf_scr, cf_scr, hb_scr, cb_scr, *, S, E, H):
    hf_scr[...] = jnp.zeros_like(hf_scr)
    cf_scr[...] = jnp.zeros_like(cf_scr)
    hb_scr[...] = jnp.zeros_like(hb_scr)
    cb_scr[...] = jnp.zeros_like(cb_scr)

    def lstm_cell(x, h, c, w_ref, b_ref):
        # w_ref is the stacked [W_ih ; W_hh] weight, shape (E+H, 4H)
        g = (jnp.dot(x, w_ref[0:E, :], preferred_element_type=jnp.float32)
             + jnp.dot(h, w_ref[E:E + H, :], preferred_element_type=jnp.float32)
             + b_ref[...])
        i_g = jax.nn.sigmoid(g[:, 0:H])
        f_g = jax.nn.sigmoid(g[:, H:2 * H])
        g_g = jnp.tanh(g[:, 2 * H:3 * H])
        o_g = jax.nn.sigmoid(g[:, 3 * H:4 * H])
        c_n = f_g * c + i_g * g_g
        h_n = o_g * jnp.tanh(c_n)
        return h_n, c_n

    def body(i, carry):
        # forward direction processes source position i
        m_f = mask_ref[i] > 0.0                           # (B, 1) bool
        h_f, c_f = hf_scr[...], cf_scr[...]
        h_fn, c_fn = lstm_cell(x_ref[i], h_f, c_f, wf_ref, bf_ref)
        hf_scr[...] = jnp.where(m_f, h_fn, h_f)
        cf_scr[...] = jnp.where(m_f, c_fn, c_f)
        outf_ref[i] = jnp.where(m_f, h_fn, 0.0)           # pad_packed -> zeros

        # backward direction processes source position S-1-i
        p = S - 1 - i
        m_b = mask_ref[p] > 0.0
        h_b, c_b = hb_scr[...], cb_scr[...]
        h_bn, c_bn = lstm_cell(x_ref[p], h_b, c_b, wb_ref, bb_ref)
        hb_scr[...] = jnp.where(m_b, h_bn, h_b)
        cb_scr[...] = jnp.where(m_b, c_bn, c_b)
        outb_ref[p] = jnp.where(m_b, h_bn, 0.0)
        return carry

    jax.lax.fori_loop(0, S, body, 0)
    lcf_ref[...] = cf_scr[...]
    lcb_ref[...] = cb_scr[...]


def run_encoder(x_emb, step_mask, wf, wb, bf, bb):
    S, B, E = x_emb.shape
    H = wf.shape[0] - E
    kern = functools.partial(_encoder_kernel, S=S, E=E, H=H)
    vmem = pl.BlockSpec(memory_space=pltpu.MemorySpace.VMEM)
    out_f, out_b, lc_f, lc_b = pl.pallas_call(
        kern,
        in_specs=[vmem] * 6,
        out_specs=[vmem] * 4,
        out_shape=[jax.ShapeDtypeStruct((S, B, H), jnp.float32),
                   jax.ShapeDtypeStruct((S, B, H), jnp.float32),
                   jax.ShapeDtypeStruct((B, H), jnp.float32),
                   jax.ShapeDtypeStruct((B, H), jnp.float32)],
        scratch_shapes=[pltpu.VMEM((B, H), jnp.float32) for _ in range(4)],
        # TODO(synk): on v7x the two directions could be sharded across the two
        # TensorCores (core_map / parallel grid axis); single-core here.
    )(x_emb, step_mask, wf, wb, bf, bb)
    return out_f, out_b, lc_f, lc_b


# ---------------------------------------------------------------------------
# Decoder: single kernel, in-kernel fori_loop over target time steps.
# Per step: LSTMCell -> dot-product attention (additive mask + softmax) ->
# att_vec_linear + tanh -> readout -> log_softmax -> gather target log-prob,
# accumulated in VMEM and written once at the end.
# ---------------------------------------------------------------------------
def _decoder_kernel(yemb_ref, tok_ref, amask_ref, lastcell_ref,
                    winit_ref, binit_ref, wdec_ref, bdec_ref,
                    wattvec_ref, wread_ref, enc_ref, encatt_ref,
                    scores_ref, sumll_ref,
                    h_scr, c_scr, att_scr, *, B, E, H, V, Td):
    # init_decoder_state: c0 = Linear(last_cell), h0 = tanh(c0); att_tm1 = 0
    c0 = (jnp.dot(lastcell_ref[...], winit_ref[...],
                  preferred_element_type=jnp.float32) + binit_ref[...])
    c_scr[...] = c0
    h_scr[...] = jnp.tanh(c0)
    att_scr[...] = jnp.zeros_like(att_scr)
    sumll_ref[...] = jnp.zeros_like(sumll_ref)

    def body(t, carry):
        y = yemb_ref[t]                                   # (B, E)
        att_prev = att_scr[...]
        h = h_scr[...]
        c = c_scr[...]

        # LSTMCell on x = concat([y_tm1_embed, att_tm1]); concat avoided via
        # the pre-stacked weight wdec = [W_ih ; W_hh] (rows: y | att | h).
        g = (jnp.dot(y, wdec_ref[0:E, :], preferred_element_type=jnp.float32)
             + jnp.dot(att_prev, wdec_ref[E:E + H, :],
                       preferred_element_type=jnp.float32)
             + jnp.dot(h, wdec_ref[E + H:E + 2 * H, :],
                       preferred_element_type=jnp.float32)
             + bdec_ref[...])
        i_g = jax.nn.sigmoid(g[:, 0:H])
        f_g = jax.nn.sigmoid(g[:, H:2 * H])
        g_g = jnp.tanh(g[:, 2 * H:3 * H])
        o_g = jax.nn.sigmoid(g[:, 3 * H:4 * H])
        c_t = f_g * c + i_g * g_g
        h_t = o_g * jnp.tanh(c_t)

        # dot_prod_attention with precomputed additive (0 / -1e9) pad mask
        aw = (jnp.sum(encatt_ref[...] * h_t[:, None, :], axis=-1)
              + amask_ref[...])                                    # (B, S)
        aw_max = jnp.max(aw, axis=-1, keepdims=True)
        ew = jnp.exp(aw - aw_max)
        inv_den = pl.reciprocal(jnp.sum(ew, axis=-1, keepdims=True),
                                approx=True)
        alpha = ew * inv_den                                       # (B, S)
        ctx = jnp.sum(alpha[:, :, None] * enc_ref[...], axis=1)    # (B, 2H)

        # att_vec_linear on concat([h_t, ctx]) via split weights; tanh
        att_t = jnp.tanh(
            jnp.dot(h_t, wattvec_ref[0:H, :],
                    preferred_element_type=jnp.float32)
            + jnp.dot(ctx, wattvec_ref[H:3 * H, :],
                      preferred_element_type=jnp.float32))
        # dropout: identity in eval mode

        score = jnp.dot(att_t, wread_ref[...],
                        preferred_element_type=jnp.float32)        # (B, V)
        smax = jnp.max(score, axis=-1, keepdims=True)
        lse = smax + jnp.log(jnp.sum(jnp.exp(score - smax), axis=-1,
                                     keepdims=True))
        logp = score - lse
        scores_ref[t] = logp

        # score_decoding_results: gather log p(tgt[t+1]); pad (id 0) -> 0;
        # accumulate the per-sentence sum in VMEM (written back once).
        tok = tok_ref[t + 1]                                       # (B, 1)
        vid = jax.lax.broadcasted_iota(jnp.int32, (B, V), 1)
        gathered = jnp.sum(jnp.where(vid == tok, logp, 0.0), axis=-1,
                           keepdims=True)
        sumll_ref[...] += gathered * (tok != 0).astype(jnp.float32)

        h_scr[...] = h_t
        c_scr[...] = c_t
        att_scr[...] = att_t
        return carry

    jax.lax.fori_loop(0, Td, body, 0)


def run_decoder(tgt_emb, tgt_tok3, add_mask, last_cell, enc_bsf, enc_att,
                params):
    T, B, E = tgt_emb.shape
    H = params["dec_whh"].shape[0]
    V = params["w_read"].shape[1]
    Td = T - 1
    wdec = jnp.concatenate([params["dec_wih"], params["dec_whh"]], axis=0)
    kern = functools.partial(_decoder_kernel, B=B, E=E, H=H, V=V, Td=Td)
    vmem = pl.BlockSpec(memory_space=pltpu.MemorySpace.VMEM)
    scores, sum_ll = pl.pallas_call(
        kern,
        in_specs=[vmem] * 12,
        out_specs=[vmem, vmem],
        out_shape=[jax.ShapeDtypeStruct((Td, B, V), jnp.float32),
                   jax.ShapeDtypeStruct((B, 1), jnp.float32)],
        scratch_shapes=[pltpu.VMEM((B, H), jnp.float32) for _ in range(3)],
        # TODO(synk): for realistic sizes (H>=512, V>=30k) the readout needs a
        # V-tiled grid with per-tile LSE partials and an explicit VMEM budget.
    )(tgt_emb, tgt_tok3, add_mask, last_cell,
      params["w_init"], params["b_init"], wdec, params["dec_b"],
      params["w_att_vec"], params["w_read"], enc_bsf, enc_att)
    return scores, sum_ll


# ---------------------------------------------------------------------------
# Full forward (mirrors Seq2SeqModel.forward for a pre-built batch)
# ---------------------------------------------------------------------------
@jax.jit
def seq2seq_forward(params, src_tokens, src_lens, tgt_tokens):
    S, B = src_tokens.shape
    src_emb = params["src_embed"][src_tokens]          # (S, B, E)   glue
    tgt_emb = params["tgt_embed"][tgt_tokens]          # (T, B, E)   glue

    # packed-sequence step mask (float, (S, B, 1)): 1 while t < src_len[b]
    step_mask = (jnp.arange(S)[:, None]
                 < src_lens[None, :]).astype(jnp.float32)[:, :, None]
    # stacked [W_ih; W_hh] per direction -> one weight ref per direction
    wf = jnp.concatenate([params["enc_wih_f"], params["enc_whh_f"]], axis=0)
    wb = jnp.concatenate([params["enc_wih_b"], params["enc_whh_b"]], axis=0)

    out_f, out_b, lc_f, lc_b = run_encoder(
        src_emb, step_mask, wf, wb, params["enc_b_f"], params["enc_b_b"])

    src_enc = jnp.concatenate([out_f, out_b], axis=-1)       # (S, B, 2H)
    last_cell = jnp.concatenate([lc_f, lc_b], axis=-1)       # (B, 2H)
    enc_bsf = jnp.transpose(src_enc, (1, 0, 2))              # (B, S, 2H)
    # att_src_linear hoisted out of the decoder kernel (computed once in XLA)
    enc_att = jnp.einsum("bsf,fh->bsh", enc_bsf, params["w_att_src"])
    # additive attention mask: 0 for valid source positions, -1e9 for pads
    add_mask = jnp.where(jnp.arange(S)[None, :] >= src_lens[:, None],
                         -1e9, 0.0).astype(jnp.float32)      # (B, S)
    tgt_tok3 = tgt_tokens.astype(jnp.int32)[:, :, None]      # (T, B, 1)

    scores, sum_ll = run_decoder(tgt_emb, tgt_tok3, add_mask, last_cell,
                                 enc_bsf, enc_att, params)
    loss = -sum_ll[:, 0]                                     # forward() loss
    return loss, scores


# ---------------------------------------------------------------------------
# Pure-JAX reference (same math) for correctness checking
# ---------------------------------------------------------------------------
def reference_forward(params, src_tokens, src_lens, tgt_tokens):
    S, B = src_tokens.shape
    T = tgt_tokens.shape[0]
    H = params["enc_whh_f"].shape[0]
    sig = jax.nn.sigmoid
    src_emb = params["src_embed"][src_tokens]
    tgt_emb = params["tgt_embed"][tgt_tokens]

    def lstm_dir(wih, whh, b, reverse):
        h = jnp.zeros((B, H), jnp.float32)
        c = jnp.zeros((B, H), jnp.float32)
        outs = [None] * S
        order = range(S - 1, -1, -1) if reverse else range(S)
        for p in order:
            g = src_emb[p] @ wih + h @ whh + b
            i_ = sig(g[:, :H]); f_ = sig(g[:, H:2 * H])
            gg = jnp.tanh(g[:, 2 * H:3 * H]); o_ = sig(g[:, 3 * H:])
            cn = f_ * c + i_ * gg
            hn = o_ * jnp.tanh(cn)
            act = (p < src_lens)[:, None].astype(jnp.float32)
            h = act * hn + (1 - act) * h
            c = act * cn + (1 - act) * c
            outs[p] = act * hn
        return jnp.stack(outs), h, c

    out_f, _, lc_f = lstm_dir(params["enc_wih_f"], params["enc_whh_f"],
                              params["enc_b_f"], False)
    out_b, _, lc_b = lstm_dir(params["enc_wih_b"], params["enc_whh_b"],
                              params["enc_b_b"], True)
    src_enc = jnp.concatenate([out_f, out_b], axis=-1)
    last_cell = jnp.concatenate([lc_f, lc_b], axis=-1)
    enc_bsf = jnp.transpose(src_enc, (1, 0, 2))
    enc_att = enc_bsf @ params["w_att_src"]
    mask = jnp.arange(S)[None, :] >= src_lens[:, None]

    c = last_cell @ params["w_init"] + params["b_init"]
    h = jnp.tanh(c)
    att = jnp.zeros((B, H), jnp.float32)
    scores, lls = [], []
    for t in range(T - 1):
        x = jnp.concatenate([tgt_emb[t], att], axis=1)
        g = x @ params["dec_wih"] + h @ params["dec_whh"] + params["dec_b"]
        i_ = sig(g[:, :H]); f_ = sig(g[:, H:2 * H])
        gg = jnp.tanh(g[:, 2 * H:3 * H]); o_ = sig(g[:, 3 * H:])
        c = f_ * c + i_ * gg
        h = o_ * jnp.tanh(c)
        aw = jnp.einsum("bsh,bh->bs", enc_att, h)
        aw = jnp.where(mask, -jnp.inf, aw)
        alpha = jax.nn.softmax(aw, axis=-1)
        ctx = jnp.einsum("bs,bsf->bf", alpha, enc_bsf)
        att = jnp.tanh(jnp.concatenate([h, ctx], axis=1) @ params["w_att_vec"])
        logp = jax.nn.log_softmax(att @ params["w_read"], axis=-1)
        scores.append(logp)
        tok = tgt_tokens[t + 1]
        ll = jnp.take_along_axis(logp, tok[:, None], axis=1)[:, 0]
        lls.append(ll * (tok != 0).astype(jnp.float32))
    return -jnp.stack(lls).sum(axis=0), jnp.stack(scores)


def init_params(key, V_src, V_tgt, E, H):
    ks = jax.random.split(key, 16)
    w = lambda k, s: (0.1 * jax.random.normal(k, s)).astype(jnp.float32)
    return dict(
        src_embed=w(ks[0], (V_src, E)),
        tgt_embed=w(ks[1], (V_tgt, E)),
        enc_wih_f=w(ks[2], (E, 4 * H)), enc_whh_f=w(ks[3], (H, 4 * H)),
        enc_b_f=w(ks[4], (1, 4 * H)),
        enc_wih_b=w(ks[5], (E, 4 * H)), enc_whh_b=w(ks[6], (H, 4 * H)),
        enc_b_b=w(ks[7], (1, 4 * H)),
        dec_wih=w(ks[8], (E + H, 4 * H)), dec_whh=w(ks[9], (H, 4 * H)),
        dec_b=w(ks[10], (1, 4 * H)),
        w_init=w(ks[11], (2 * H, H)), b_init=w(ks[12], (1, H)),
        w_att_src=w(ks[13], (2 * H, H)),
        w_att_vec=w(ks[14], (3 * H, H)),
        w_read=w(ks[15], (H, V_tgt)),
    )


if __name__ == "__main__":
    V_src, V_tgt = 100, 128
    E, H = 32, 32
    B, S, T = 8, 16, 8

    key = jax.random.PRNGKey(0)
    kp, ks, kt = jax.random.split(key, 3)
    params = init_params(kp, V_src, V_tgt, E, H)

    src_lens = jnp.array([16, 16, 15, 14, 13, 12, 11, 10], dtype=jnp.int32)
    src_tokens = jax.random.randint(ks, (S, B), 1, V_src, dtype=jnp.int32)
    src_tokens = jnp.where(jnp.arange(S)[:, None] < src_lens[None, :],
                           src_tokens, 0)

    tgt_lens = jnp.array([8, 7, 8, 6, 8, 5, 7, 8], dtype=jnp.int32)
    tgt_tokens = jax.random.randint(kt, (T, B), 2, V_tgt, dtype=jnp.int32)
    tgt_tokens = tgt_tokens.at[0, :].set(1)      # <s>
    tgt_tokens = jnp.where(jnp.arange(T)[:, None] < tgt_lens[None, :],
                           tgt_tokens, 0)        # pad = 0

    loss_k, scores_k = seq2seq_forward(params, src_tokens, src_lens, tgt_tokens)
    jax.block_until_ready((loss_k, scores_k))

    loss_r, scores_r = reference_forward(params, src_tokens, src_lens, tgt_tokens)
    assert np.allclose(np.asarray(loss_k), np.asarray(loss_r),
                       rtol=2e-2, atol=2e-2), (loss_k, loss_r)
    assert np.allclose(np.asarray(scores_k), np.asarray(scores_r),
                       rtol=2e-2, atol=2e-2)

    # TODO(synk): training-mode dropout / LabelSmoothing loss path not implemented
    # (eval-mode forward only); beam/greedy search are host-side loops, out of scope.
    print("KERNEL_OK")
</pallas_src>

<mosaic_0001>
module attributes {stable_mosaic.version = 11 : i64} {
  func.func @_encoder_kernel(%arg0: memref<16x8x32xf32, #tpu.memory_space<vmem>>, %arg1: memref<16x8x1xf32, #tpu.memory_space<vmem>>, %arg2: memref<64x128xf32, #tpu.memory_space<vmem>>, %arg3: memref<64x128xf32, #tpu.memory_space<vmem>>, %arg4: memref<1x128xf32, #tpu.memory_space<vmem>>, %arg5: memref<1x128xf32, #tpu.memory_space<vmem>>, %arg6: memref<16x8x32xf32, #tpu.memory_space<vmem>>, %arg7: memref<16x8x32xf32, #tpu.memory_space<vmem>>, %arg8: memref<8x32xf32, #tpu.memory_space<vmem>>, %arg9: memref<8x32xf32, #tpu.memory_space<vmem>>, %arg10: memref<8x32xf32, #tpu.memory_space<vmem>>, %arg11: memref<8x32xf32, #tpu.memory_space<vmem>>, %arg12: memref<8x32xf32, #tpu.memory_space<vmem>>, %arg13: memref<8x32xf32, #tpu.memory_space<vmem>>) attributes {dimension_semantics = [], scalar_prefetch = 0 : i64, scratch_operands = 4 : i64, tpu.core_type = #tpu.core_type<tc>} {
    %cst = arith.constant 0.000000e+00 : f32
    %0 = vector.broadcast %cst : f32 to vector<8x32xf32>
    %c0 = arith.constant 0 : index
    %c0_0 = arith.constant 0 : index
    %1 = vector.load %arg10[%c0, %c0_0] : memref<8x32xf32, #tpu.memory_space<vmem>>, vector<8x32xf32>
    tpu.vector_store %arg10[%c0, %c0_0], %0 {strides = array<i32>} : memref<8x32xf32, #tpu.memory_space<vmem>>, vector<8x32xf32>,
    %cst_1 = arith.constant 0.000000e+00 : f32
    %2 = vector.broadcast %cst_1 : f32 to vector<8x32xf32>
    %c0_2 = arith.constant 0 : index
    %c0_3 = arith.constant 0 : index
    %3 = vector.load %arg11[%c0_2, %c0_3] : memref<8x32xf32, #tpu.memory_space<vmem>>, vector<8x32xf32>
    tpu.vector_store %arg11[%c0_2, %c0_3], %2 {strides = array<i32>} : memref<8x32xf32, #tpu.memory_space<vmem>>, vector<8x32xf32>,
    %cst_4 = arith.constant 0.000000e+00 : f32
    %4 = vector.broadcast %cst_4 : f32 to vector<8x32xf32>
    %c0_5 = arith.constant 0 : index
    %c0_6 = arith.constant 0 : index
    %5 = vector.load %arg12[%c0_5, %c0_6] : memref<8x32xf32, #tpu.memory_space<vmem>>, vector<8x32xf32>
    tpu.vector_store %arg12[%c0_5, %c0_6], %4 {strides = array<i32>} : memref<8x32xf32, #tpu.memory_space<vmem>>, vector<8x32xf32>,
    %cst_7 = arith.constant 0.000000e+00 : f32
    %6 = vector.broadcast %cst_7 : f32 to vector<8x32xf32>
    %c0_8 = arith.constant 0 : index
    %c0_9 = arith.constant 0 : index
    %7 = vector.load %arg13[%c0_8, %c0_9] : memref<8x32xf32, #tpu.memory_space<vmem>>, vector<8x32xf32>
    tpu.vector_store %arg13[%c0_8, %c0_9], %6 {strides = array<i32>} : memref<8x32xf32, #tpu.memory_space<vmem>>, vector<8x32xf32>,
    %c0_i32 = arith.constant 0 : i32
    %c16_i32 = arith.constant 16 : i32
    %8 = arith.addi %c0_i32, %c16_i32 : i32
    %c1_i32 = arith.constant 1 : i32
    scf.for %arg14 = %c0_i32 to %8 step %c1_i32  : i32 {
      %13 = arith.index_cast %arg14 : i32 to index
      %c0_19 = arith.constant 0 : index
      %c0_20 = arith.constant 0 : index
      %14 = vector.load %arg1[%13, %c0_19, %c0_20] : memref<16x8x1xf32, #tpu.memory_space<vmem>>, vector<1x8x1xf32>
      %15 = vector.shape_cast %14 : vector<1x8x1xf32> to vector<8x1xf32>
      %cst_21 = arith.constant 0.000000e+00 : f32
      %16 = vector.broadcast %cst_21 : f32 to vector<8x1xf32>
      %17 = arith.cmpf ogt, %15, %16 : vector<8x1xf32>
      %c0_22 = arith.constant 0 : index
      %c0_23 = arith.constant 0 : index
      %18 = vector.load %arg10[%c0_22, %c0_23] : memref<8x32xf32, #tpu.memory_space<vmem>>, vector<8x32xf32>
      %c0_24 = arith.constant 0 : index
      %c0_25 = arith.constant 0 : index
      %19 = vector.load %arg11[%c0_24, %c0_25] : memref<8x32xf32, #tpu.memory_space<vmem>>, vector<8x32xf32>
      %20 = arith.index_cast %arg14 : i32 to index
      %c0_26 = arith.constant 0 : index
      %c0_27 = arith.constant 0 : index
      %21 = vector.load %arg0[%20, %c0_26, %c0_27] : memref<16x8x32xf32, #tpu.memory_space<vmem>>, vector<1x8x32xf32>
      %22 = vector.shape_cast %21 : vector<1x8x32xf32> to vector<8x32xf32>
      %c0_28 = arith.constant 0 : index
      %c0_29 = arith.constant 0 : index
      %23 = vector.load %arg2[%c0_28, %c0_29] : memref<64x128xf32, #tpu.memory_space<vmem>>, vector<32x128xf32>
      %cst_30 = arith.constant dense<0.000000e+00> : vector<8x128xf32>
      %24 = tpu.matmul %22, %23, %cst_30 {dimension_numbers = #tpu.dot_dimension_numbers<[1], [0], [0], [1], [0, 0, 1, 1], [], []>} : vector<8x32xf32>, vector<32x128xf32>, vector<8x128xf32> -> vector<8x128xf32>
      %c32 = arith.constant 32 : index
      %c0_31 = arith.constant 0 : index
      %25 = vector.load %arg2[%c32, %c0_31] : memref<64x128xf32, #tpu.memory_space<vmem>>, vector<32x128xf32>
      %cst_32 = arith.constant dense<0.000000e+00> : vector<8x128xf32>
      %26 = tpu.matmul %18, %25, %cst_32 {dimension_numbers = #tpu.dot_dimension_numbers<[1], [0], [0], [1], [0, 0, 1, 1], [], []>} : vector<8x32xf32>, vector<32x128xf32>, vector<8x128xf32> -> vector<8x128xf32>
      %27 = arith.addf %24, %26 : vector<8x128xf32>
      %c0_33 = arith.constant 0 : index
      %c0_34 = arith.constant 0 : index
      %28 = vector.load %arg4[%c0_33, %c0_34] : memref<1x128xf32, #tpu.memory_space<vmem>>, vector<1x128xf32>
      %29 = vector.broadcast %28 : vector<1x128xf32> to vector<8x128xf32>
      %30 = arith.addf %27, %29 : vector<8x128xf32>
      %31 = vector.extract_strided_slice %30 {offsets = [0, 0], sizes = [8, 32], strides = [1, 1]} : vector<8x128xf32> to vector<8x32xf32>
      %32 = arith.negf %31 : vector<8x32xf32>
      %33 = math.exp %32 : vector<8x32xf32>
      %cst_35 = arith.constant 1.000000e+00 : f32
      %34 = vector.broadcast %cst_35 : f32 to vector<8x32xf32>
      %35 = arith.addf %34, %33 : vector<8x32xf32>
      %36 = arith.divf %34, %35 : vector<8x32xf32>
      %37 = vector.extract_strided_slice %30 {offsets = [0, 32], sizes = [8, 32], strides = [1, 1]} : vector<8x128xf32> to vector<8x32xf32>
      %38 = arith.negf %37 : vector<8x32xf32>
      %39 = math.exp %38 : vector<8x32xf32>
      %cst_36 = arith.constant 1.000000e+00 : f32
      %40 = vector.broadcast %cst_36 : f32 to vector<8x32xf32>
      %41 = arith.addf %40, %39 : vector<8x32xf32>
      %42 = arith.divf %40, %41 : vector<8x32xf32>
      %43 = vector.extract_strided_slice %30 {offsets = [0, 64], sizes = [8, 32], strides = [1, 1]} : vector<8x128xf32> to vector<8x32xf32>
      %44 = math.tanh %43 : vector<8x32xf32>
      %45 = vector.extract_strided_slice %30 {offsets = [0, 96], sizes = [8, 32], strides = [1, 1]} : vector<8x128xf32> to vector<8x32xf32>
      %46 = arith.negf %45 : vector<8x32xf32>
      %47 = math.exp %46 : vector<8x32xf32>
      %cst_37 = arith.constant 1.000000e+00 : f32
      %48 = vector.broadcast %cst_37 : f32 to vector<8x32xf32>
      %49 = arith.addf %48, %47 : vector<8x32xf32>
      %50 = arith.divf %48, %49 : vector<8x32xf32>
      %51 = arith.mulf %42, %19 : vector<8x32xf32>
      %52 = arith.mulf %36, %44 : vector<8x32xf32>
      %53 = arith.addf %51, %52 : vector<8x32xf32>
      %54 = math.tanh %53 : vector<8x32xf32>
      %55 = arith.mulf %50, %54 : vector<8x32xf32>
      %56 = vector.shape_cast %17 : vector<8x1xi1> to vector<8x1xi1>
      %57 = vector.broadcast %56 : vector<8x1xi1> to vector<8x32xi1>
      %58 = arith.select %57, %55, %18 : vector<8x32xi1>, vector<8x32xf32>
      %c0_38 = arith.constant 0 : index
      %c0_39 = arith.constant 0 : index
      %59 = vector.load %arg10[%c0_38, %c0_39] : memref<8x32xf32, #tpu.memory_space<vmem>>, vector<8x32xf32>
      tpu.vector_store %arg10[%c0_38, %c0_39], %58 {strides = array<i32>} : memref<8x32xf32, #tpu.memory_space<vmem>>, vector<8x32xf32>,
      %60 = vector.shape_cast %17 : vector<8x1xi1> to vector<8x1xi1>
      %61 = vector.broadcast %60 : vector<8x1xi1> to vector<8x32xi1>
      %62 = arith.select %61, %53, %19 : vector<8x32xi1>, vector<8x32xf32>
      %c0_40 = arith.constant 0 : index
      %c0_41 = arith.constant 0 : index
      %63 = vector.load %arg11[%c0_40, %c0_41] : memref<8x32xf32, #tpu.memory_space<vmem>>, vector<8x32xf32>
      tpu.vector_store %arg11[%c0_40, %c0_41], %62 {strides = array<i32>} : memref<8x32xf32, #tpu.memory_space<vmem>>, vector<8x32xf32>,
      %cst_42 = arith.constant 0.000000e+00 : f32
      %64 = vector.shape_cast %17 : vector<8x1xi1> to vector<8x1xi1>
      %65 = vector.broadcast %64 : vector<8x1xi1> to vector<8x32xi1>
      %66 = vector.broadcast %cst_42 : f32 to vector<8x32xf32>
      %67 = arith.select %65, %55, %66 : vector<8x32xi1>, vector<8x32xf32>
      %68 = arith.index_cast %arg14 : i32 to index
      %c0_43 = arith.constant 0 : index
      %c0_44 = arith.constant 0 : index
      %69 = vector.load %arg6[%68, %c0_43, %c0_44] : memref<16x8x32xf32, #tpu.memory_space<vmem>>, vector<1x8x32xf32>
      %70 = vector.shape_cast %69 : vector<1x8x32xf32> to vector<8x32xf32>
      %71 = vector.shape_cast %67 : vector<8x32xf32> to vector<1x8x32xf32>
      tpu.vector_store %arg6[%68, %c0_43, %c0_44], %71 {strides = array<i32>} : memref<16x8x32xf32, #tpu.memory_space<vmem>>, vector<1x8x32xf32>,
      %c15_i32 = arith.constant 15 : i32
      %72 = arith.subi %c15_i32, %arg14 : i32
      %73 = arith.index_cast %72 : i32 to index
      %c0_45 = arith.constant 0 : index
      %c0_46 = arith.constant 0 : index
      %74 = vector.load %arg1[%73, %c0_45, %c0_46] : memref<16x8x1xf32, #tpu.memory_space<vmem>>, vector<1x8x1xf32>
      %75 = vector.shape_cast %74 : vector<1x8x1xf32> to vector<8x1xf32>
      %cst_47 = arith.constant 0.000000e+00 : f32
      %76 = vector.broadcast %cst_47 : f32 to vector<8x1xf32>
      %77 = arith.cmpf ogt, %75, %76 : vector<8x1xf32>
      %c0_48 = arith.constant 0 : index
      %c0_49 = arith.constant 0 : index
      %78 = vector.load %arg12[%c0_48, %c0_49] : memref<8x32xf32, #tpu.memory_space<vmem>>, vector<8x32xf32>
      %c0_50 = arith.constant 0 : index
      %c0_51 = arith.constant 0 : index
      %79 = vector.load %arg13[%c0_50, %c0_51] : memref<8x32xf32, #tpu.memory_space<vmem>>, vector<8x32xf32>
      %80 = arith.index_cast %72 : i32 to index
      %c0_52 = arith.constant 0 : index
      %c0_53 = arith.constant 0 : index
      %81 = vector.load %arg0[%80, %c0_52, %c0_53] : memref<16x8x32xf32, #tpu.memory_space<vmem>>, vector<1x8x32xf32>
      %82 = vector.shape_cast %81 : vector<1x8x32xf32> to vector<8x32xf32>
      %c0_54 = arith.constant 0 : index
      %c0_55 = arith.constant 0 : index
      %83 = vector.load %arg3[%c0_54, %c0_55] : memref<64x128xf32, #tpu.memory_space<vmem>>, vector<32x128xf32>
      %cst_56 = arith.constant dense<0.000000e+00> : vector<8x128xf32>
      %84 = tpu.matmul %82, %83, %cst_56 {dimension_numbers = #tpu.dot_dimension_numbers<[1], [0], [0], [1], [0, 0, 1, 1], [], []>} : vector<8x32xf32>, vector<32x128xf32>, vector<8x128xf32> -> vector<8x128xf32>
      %c32_57 = arith.constant 32 : index
      %c0_58 = arith.constant 0 : index
      %85 = vector.load %arg3[%c32_57, %c0_58] : memref<64x128xf32, #tpu.memory_space<vmem>>, vector<32x128xf32>
      %cst_59 = arith.constant dense<0.000000e+00> : vector<8x128xf32>
      %86 = tpu.matmul %78, %85, %cst_59 {dimension_numbers = #tpu.dot_dimension_numbers<[1], [0], [0], [1], [0, 0, 1, 1], [], []>} : vector<8x32xf32>, vector<32x128xf32>, vector<8x128xf32> -> vector<8x128xf32>
      %87 = arith.addf %84, %86 : vector<8x128xf32>
      %c0_60 = arith.constant 0 : index
      %c0_61 = arith.constant 0 : index
      %88 = vector.load %arg5[%c0_60, %c0_61] : memref<1x128xf32, #tpu.memory_space<vmem>>, vector<1x128xf32>
      %89 = vector.broadcast %88 : vector<1x128xf32> to vector<8x128xf32>
      %90 = arith.addf %87, %89 : vector<8x128xf32>
      %91 = vector.extract_strided_slice %90 {offsets = [0, 0], sizes = [8, 32], strides = [1, 1]} : vector<8x128xf32> to vector<8x32xf32>
      %92 = arith.negf %91 : vector<8x32xf32>
      %93 = math.exp %92 : vector<8x32xf32>
      %cst_62 = arith.constant 1.000000e+00 : f32
      %94 = vector.broadcast %cst_62 : f32 to vector<8x32xf32>
      %95 = arith.addf %94, %93 : vector<8x32xf32>
      %96 = arith.divf %94, %95 : vector<8x32xf32>
      %97 = vector.extract_strided_slice %90 {offsets = [0, 32], sizes = [8, 32], strides = [1, 1]} : vector<8x128xf32> to vector<8x32xf32>
      %98 = arith.negf %97 : vector<8x32xf32>
      %99 = math.exp %98 : vector<8x32xf32>
      %cst_63 = arith.constant 1.000000e+00 : f32
      %100 = vector.broadcast %cst_63 : f32 to vector<8x32xf32>
      %101 = arith.addf %100, %99 : vector<8x32xf32>
      %102 = arith.divf %100, %101 : vector<8x32xf32>
      %103 = vector.extract_strided_slice %90 {offsets = [0, 64], sizes = [8, 32], strides = [1, 1]} : vector<8x128xf32> to vector<8x32xf32>
      %104 = math.tanh %103 : vector<8x32xf32>
      %105 = vector.extract_strided_slice %90 {offsets = [0, 96], sizes = [8, 32], strides = [1, 1]} : vector<8x128xf32> to vector<8x32xf32>
      %106 = arith.negf %105 : vector<8x32xf32>
      %107 = math.exp %106 : vector<8x32xf32>
      %cst_64 = arith.constant 1.000000e+00 : f32
      %108 = vector.broadcast %cst_64 : f32 to vector<8x32xf32>
      %109 = arith.addf %108, %107 : vector<8x32xf32>
      %110 = arith.divf %108, %109 : vector<8x32xf32>
      %111 = arith.mulf %102, %79 : vector<8x32xf32>
      %112 = arith.mulf %96, %104 : vector<8x32xf32>
      %113 = arith.addf %111, %112 : vector<8x32xf32>
      %114 = math.tanh %113 : vector<8x32xf32>
      %115 = arith.mulf %110, %114 : vector<8x32xf32>
      %116 = vector.shape_cast %77 : vector<8x1xi1> to vector<8x1xi1>
      %117 = vector.broadcast %116 : vector<8x1xi1> to vector<8x32xi1>
      %118 = arith.select %117, %115, %78 : vector<8x32xi1>, vector<8x32xf32>
      %c0_65 = arith.constant 0 : index
      %c0_66 = arith.constant 0 : index
      %119 = vector.load %arg12[%c0_65, %c0_66] : memref<8x32xf32, #tpu.memory_space<vmem>>, vector<8x32xf32>
      tpu.vector_store %arg12[%c0_65, %c0_66], %118 {strides = array<i32>} : memref<8x32xf32, #tpu.memory_space<vmem>>, vector<8x32xf32>,
      %120 = vector.shape_cast %77 : vector<8x1xi1> to vector<8x1xi1>
      %121 = vector.broadcast %120 : vector<8x1xi1> to vector<8x32xi1>
      %122 = arith.select %121, %113, %79 : vector<8x32xi1>, vector<8x32xf32>
      %c0_67 = arith.constant 0 : index
      %c0_68 = arith.constant 0 : index
      %123 = vector.load %arg13[%c0_67, %c0_68] : memref<8x32xf32, #tpu.memory_space<vmem>>, vector<8x32xf32>
      tpu.vector_store %arg13[%c0_67, %c0_68], %122 {strides = array<i32>} : memref<8x32xf32, #tpu.memory_space<vmem>>, vector<8x32xf32>,
      %cst_69 = arith.constant 0.000000e+00 : f32
      %124 = vector.shape_cast %77 : vector<8x1xi1> to vector<8x1xi1>
      %125 = vector.broadcast %124 : vector<8x1xi1> to vector<8x32xi1>
      %126 = vector.broadcast %cst_69 : f32 to vector<8x32xf32>
      %127 = arith.select %125, %115, %126 : vector<8x32xi1>, vector<8x32xf32>
      %128 = arith.index_cast %72 : i32 to index
      %c0_70 = arith.constant 0 : index
      %c0_71 = arith.constant 0 : index
      %129 = vector.load %arg7[%128, %c0_70, %c0_71] : memref<16x8x32xf32, #tpu.memory_space<vmem>>, vector<1x8x32xf32>
      %130 = vector.shape_cast %129 : vector<1x8x32xf32> to vector<8x32xf32>
      %131 = vector.shape_cast %127 : vector<8x32xf32> to vector<1x8x32xf32>
      tpu.vector_store %arg7[%128, %c0_70, %c0_71], %131 {strides = array<i32>} : memref<16x8x32xf32, #tpu.memory_space<vmem>>, vector<1x8x32xf32>,
    }
    %c16_i32_10 = arith.constant 16 : i32
    %c0_11 = arith.constant 0 : index
    %c0_12 = arith.constant 0 : index
    %9 = vector.load %arg11[%c0_11, %c0_12] : memref<8x32xf32, #tpu.memory_space<vmem>>, vector<8x32xf32>
    %c0_13 = arith.constant 0 : index
    %c0_14 = arith.constant 0 : index
    %10 = vector.load %arg8[%c0_13, %c0_14] : memref<8x32xf32, #tpu.memory_space<vmem>>, vector<8x32xf32>
    tpu.vector_store %arg8[%c0_13, %c0_14], %9 {strides = array<i32>} : memref<8x32xf32, #tpu.memory_space<vmem>>, vector<8x32xf32>,
    %c0_15 = arith.constant 0 : index
    %c0_16 = arith.constant 0 : index
    %11 = vector.load %arg13[%c0_15, %c0_16] : memref<8x32xf32, #tpu.memory_space<vmem>>, vector<8x32xf32>
    %c0_17 = arith.constant 0 : index
    %c0_18 = arith.constant 0 : index
    %12 = vector.load %arg9[%c0_17, %c0_18] : memref<8x32xf32, #tpu.memory_space<vmem>>, vector<8x32xf32>
    tpu.vector_store %arg9[%c0_17, %c0_18], %11 {strides = array<i32>} : memref<8x32xf32, #tpu.memory_space<vmem>>, vector<8x32xf32>,
    return
  }
}

module attributes {stable_mosaic.version = 11 : i64} {
  func.func @_decoder_kernel(%arg0: memref<8x8x32xf32, #tpu.memory_space<vmem>>, %arg1: memref<8x8x1xi32, #tpu.memory_space<vmem>>, %arg2: memref<8x16xf32, #tpu.memory_space<vmem>>, %arg3: memref<8x64xf32, #tpu.memory_space<vmem>>, %arg4: memref<64x32xf32, #tpu.memory_space<vmem>>, %arg5: memref<1x32xf32, #tpu.memory_space<vmem>>, %arg6: memref<96x128xf32, #tpu.memory_space<vmem>>, %arg7: memref<1x128xf32, #tpu.memory_space<vmem>>, %arg8: memref<96x32xf32, #tpu.memory_space<vmem>>, %arg9: memref<32x128xf32, #tpu.memory_space<vmem>>, %arg10: memref<8x16x64xf32, #tpu.memory_space<vmem>>, %arg11: memref<8x16x32xf32, #tpu.memory_space<vmem>>, %arg12: memref<7x8x128xf32, #tpu.memory_space<vmem>>, %arg13: memref<8x1xf32, #tpu.memory_space<vmem>>, %arg14: memref<8x32xf32, #tpu.memory_space<vmem>>, %arg15: memref<8x32xf32, #tpu.memory_space<vmem>>, %arg16: memref<8x32xf32, #tpu.memory_space<vmem>>) attributes {dimension_semantics = [], scalar_prefetch = 0 : i64, scratch_operands = 3 : i64, tpu.core_type = #tpu.core_type<tc>} {
    %c0 = arith.constant 0 : index
    %c0_0 = arith.constant 0 : index
    %0 = vector.load %arg3[%c0, %c0_0] : memref<8x64xf32, #tpu.memory_space<vmem>>, vector<8x64xf32>
    %c0_1 = arith.constant 0 : index
    %c0_2 = arith.constant 0 : index
    %1 = vector.load %arg4[%c0_1, %c0_2] : memref<64x32xf32, #tpu.memory_space<vmem>>, vector<64x32xf32>
    %cst = arith.constant dense<0.000000e+00> : vector<8x32xf32>
    %2 = tpu.matmul %0, %1, %cst {dimension_numbers = #tpu.dot_dimension_numbers<[1], [0], [0], [1], [0, 0, 1, 1], [], []>} : vector<8x64xf32>, vector<64x32xf32>, vector<8x32xf32> -> vector<8x32xf32>
    %c0_3 = arith.constant 0 : index
    %c0_4 = arith.constant 0 : index
    %3 = vector.load %arg5[%c0_3, %c0_4] : memref<1x32xf32, #tpu.memory_space<vmem>>, vector<1x32xf32>
    %4 = vector.broadcast %3 : vector<1x32xf32> to vector<8x32xf32>
    %5 = arith.addf %2, %4 : vector<8x32xf32>
    %c0_5 = arith.constant 0 : index
    %c0_6 = arith.constant 0 : index
    %6 = vector.load %arg15[%c0_5, %c0_6] : memref<8x32xf32, #tpu.memory_space<vmem>>, vector<8x32xf32>
    tpu.vector_store %arg15[%c0_5, %c0_6], %5 {strides = array<i32>} : memref<8x32xf32, #tpu.memory_space<vmem>>, vector<8x32xf32>,
    %7 = math.tanh %5 : vector<8x32xf32>
    %c0_7 = arith.constant 0 : index
    %c0_8 = arith.constant 0 : index
    %8 = vector.load %arg14[%c0_7, %c0_8] : memref<8x32xf32, #tpu.memory_space<vmem>>, vector<8x32xf32>
    tpu.vector_store %arg14[%c0_7, %c0_8], %7 {strides = array<i32>} : memref<8x32xf32, #tpu.memory_space<vmem>>, vector<8x32xf32>,
    %cst_9 = arith.constant 0.000000e+00 : f32
    %9 = vector.broadcast %cst_9 : f32 to vector<8x32xf32>
    %c0_10 = arith.constant 0 : index
    %c0_11 = arith.constant 0 : index
    %10 = vector.load %arg16[%c0_10, %c0_11] : memref<8x32xf32, #tpu.memory_space<vmem>>, vector<8x32xf32>
    tpu.vector_store %arg16[%c0_10, %c0_11], %9 {strides = array<i32>} : memref<8x32xf32, #tpu.memory_space<vmem>>, vector<8x32xf32>,
    %cst_12 = arith.constant 0.000000e+00 : f32
    %11 = vector.broadcast %cst_12 : f32 to vector<8x1xf32>
    %c0_13 = arith.constant 0 : index
    %c0_14 = arith.constant 0 : index
    %12 = vector.load %arg13[%c0_13, %c0_14] : memref<8x1xf32, #tpu.memory_space<vmem>>, vector<8x1xf32>
    tpu.vector_store %arg13[%c0_13, %c0_14], %11 {strides = array<i32>} : memref<8x1xf32, #tpu.memory_space<vmem>>, vector<8x1xf32>,
    %c0_i32 = arith.constant 0 : i32
    %c7_i32 = arith.constant 7 : i32
    %13 = arith.addi %c0_i32, %c7_i32 : i32
    %c1_i32 = arith.constant 1 : i32
    scf.for %arg17 = %c0_i32 to %13 step %c1_i32  : i32 {
      %14 = arith.index_cast %arg17 : i32 to index
      %c0_16 = arith.constant 0 : index
      %c0_17 = arith.constant 0 : index
      %15 = vector.load %arg0[%14, %c0_16, %c0_17] : memref<8x8x32xf32, #tpu.memory_space<vmem>>, vector<1x8x32xf32>
      %16 = vector.shape_cast %15 : vector<1x8x32xf32> to vector<8x32xf32>
      %c0_18 = arith.constant 0 : index
      %c0_19 = arith.constant 0 : index
      %17 = vector.load %arg16[%c0_18, %c0_19] : memref<8x32xf32, #tpu.memory_space<vmem>>, vector<8x32xf32>
      %c0_20 = arith.constant 0 : index
      %c0_21 = arith.constant 0 : index
      %18 = vector.load %arg14[%c0_20, %c0_21] : memref<8x32xf32, #tpu.memory_space<vmem>>, vector<8x32xf32>
      %c0_22 = arith.constant 0 : index
      %c0_23 = arith.constant 0 : index
      %19 = vector.load %arg15[%c0_22, %c0_23] : memref<8x32xf32, #tpu.memory_space<vmem>>, vector<8x32xf32>
      %c0_24 = arith.constant 0 : index
      %c0_25 = arith.constant 0 : index
      %20 = vector.load %arg6[%c0_24, %c0_25] : memref<96x128xf32, #tpu.memory_space<vmem>>, vector<32x128xf32>
      %cst_26 = arith.constant dense<0.000000e+00> : vector<8x128xf32>
      %21 = tpu.matmul %16, %20, %cst_26 {dimension_numbers = #tpu.dot_dimension_numbers<[1], [0], [0], [1], [0, 0, 1, 1], [], []>} : vector<8x32xf32>, vector<32x128xf32>, vector<8x128xf32> -> vector<8x128xf32>
      %c32 = arith.constant 32 : index
      %c0_27 = arith.constant 0 : index
      %22 = vector.load %arg6[%c32, %c0_27] : memref<96x128xf32, #tpu.memory_space<vmem>>, vector<32x128xf32>
      %cst_28 = arith.constant dense<0.000000e+00> : vector<8x128xf32>
      %23 = tpu.matmul %17, %22, %cst_28 {dimension_numbers = #tpu.dot_dimension_numbers<[1], [0], [0], [1], [0, 0, 1, 1], [], []>} : vector<8x32xf32>, vector<32x128xf32>, vector<8x128xf32> -> vector<8x128xf32>
      %24 = arith.addf %21, %23 : vector<8x128xf32>
      %c64 = arith.constant 64 : index
      %c0_29 = arith.constant 0 : index
      %25 = vector.load %arg6[%c64, %c0_29] : memref<96x128xf32, #tpu.memory_space<vmem>>, vector<32x128xf32>
      %cst_30 = arith.constant dense<0.000000e+00> : vector<8x128xf32>
      %26 = tpu.matmul %18, %25, %cst_30 {dimension_numbers = #tpu.dot_dimension_numbers<[1], [0], [0], [1], [0, 0, 1, 1], [], []>} : vector<8x32xf32>, vector<32x128xf32>, vector<8x128xf32> -> vector<8x128xf32>
      %27 = arith.addf %24, %26 : vector<8x128xf32>
      %c0_31 = arith.constant 0 : index
      %c0_32 = arith.constant 0 : index
      %28 = vector.load %arg7[%c0_31, %c0_32] : memref<1x128xf32, #tpu.memory_space<vmem>>, vector<1x128xf32>
      %29 = vector.broadcast %28 : vector<1x128xf32> to vector<8x128xf32>
      %30 = arith.addf %27, %29 : vector<8x128xf32>
      %31 = vector.extract_strided_slice %30 {offsets = [0, 0], sizes = [8, 32], strides = [1, 1]} : vector<8x128xf32> to vector<8x32xf32>
      %32 = arith.negf %31 : vector<8x32xf32>
      %33 = math.exp %32 : vector<8x32xf32>
      %cst_33 = arith.constant 1.000000e+00 : f32
      %34 = vector.broadcast %cst_33 : f32 to vector<8x32xf32>
      %35 = arith.addf %34, %33 : vector<8x32xf32>
      %36 = arith.divf %34, %35 : vector<8x32xf32>
      %37 = vector.extract_strided_slice %30 {offsets = [0, 32], sizes = [8, 32], strides = [1, 1]} : vector<8x128xf32> to vector<8x32xf32>
      %38 = arith.negf %37 : vector<8x32xf32>
      %39 = math.exp %38 : vector<8x32xf32>
      %cst_34 = arith.constant 1.000000e+00 : f32
      %40 = vector.broadcast %cst_34 : f32 to vector<8x32xf32>
      %41 = arith.addf %40, %39 : vector<8x32xf32>
      %42 = arith.divf %40, %41 : vector<8x32xf32>
      %43 = vector.extract_strided_slice %30 {offsets = [0, 64], sizes = [8, 32], strides = [1, 1]} : vector<8x128xf32> to vector<8x32xf32>
      %44 = math.tanh %43 : vector<8x32xf32>
      %45 = vector.extract_strided_slice %30 {offsets = [0, 96], sizes = [8, 32], strides = [1, 1]} : vector<8x128xf32> to vector<8x32xf32>
      %46 = arith.negf %45 : vector<8x32xf32>
      %47 = math.exp %46 : vector<8x32xf32>
      %cst_35 = arith.constant 1.000000e+00 : f32
      %48 = vector.broadcast %cst_35 : f32 to vector<8x32xf32>
      %49 = arith.addf %48, %47 : vector<8x32xf32>
      %50 = arith.divf %48, %49 : vector<8x32xf32>
      %51 = arith.mulf %42, %19 : vector<8x32xf32>
      %52 = arith.mulf %36, %44 : vector<8x32xf32>
      %53 = arith.addf %51, %52 : vector<8x32xf32>
      %54 = math.tanh %53 : vector<8x32xf32>
      %55 = arith.mulf %50, %54 : vector<8x32xf32>
      %c0_36 = arith.constant 0 : index
      %c0_37 = arith.constant 0 : index
      %c0_38 = arith.constant 0 : index
      %56 = vector.load %arg11[%c0_36, %c0_37, %c0_38] : memref<8x16x32xf32, #tpu.memory_space<vmem>>, vector<8x16x32xf32>
      %57 = vector.shape_cast %55 : vector<8x32xf32> to vector<8x1x32xf32>
      %58 = vector.broadcast %57 : vector<8x1x32xf32> to vector<8x16x32xf32>
      %59 = arith.mulf %56, %58 : vector<8x16x32xf32>
      %cst_39 = arith.constant dense<0.000000e+00> : vector<8x16xf32>
      %60 = vector.multi_reduction <add>, %59, %cst_39 [2] : vector<8x16x32xf32> to vector<8x16xf32>
      %c0_40 = arith.constant 0 : index
      %c0_41 = arith.constant 0 : index
      %61 = vector.load %arg2[%c0_40, %c0_41] : memref<8x16xf32, #tpu.memory_space<vmem>>, vector<8x16xf32>
      %62 = arith.addf %60, %61 : vector<8x16xf32>
      %cst_42 = arith.constant dense<0xFF800000> : vector<8xf32>
      %63 = vector.multi_reduction <maximumf>, %62, %cst_42 [1] : vector<8x16xf32> to vector<8xf32>
      %64 = vector.shape_cast %63 : vector<8xf32> to vector<8x1xf32>
      %65 = vector.broadcast %64 : vector<8x1xf32> to vector<8x16xf32>
      %66 = arith.subf %62, %65 : vector<8x16xf32>
      %67 = math.exp %66 : vector<8x16xf32>
      %cst_43 = arith.constant dense<0.000000e+00> : vector<8xf32>
      %68 = vector.multi_reduction <add>, %67, %cst_43 [1] : vector<8x16xf32> to vector<8xf32>
      %69 = vector.shape_cast %68 : vector<8xf32> to vector<8x1xf32>
      %70 = tpu.reciprocal %69 {approx = true} : vector<8x1xf32> -> vector<8x1xf32>
      %71 = vector.broadcast %70 : vector<8x1xf32> to vector<8x16xf32>
      %72 = arith.mulf %67, %71 : vector<8x16xf32>
      %73 = vector.shape_cast %72 : vector<8x16xf32> to vector<8x16x1xf32>
      %c0_44 = arith.constant 0 : index
      %c0_45 = arith.constant 0 : index
      %c0_46 = arith.constant 0 : index
      %74 = vector.load %arg10[%c0_44, %c0_45, %c0_46] : memref<8x16x64xf32, #tpu.memory_space<vmem>>, vector<8x16x64xf32>
      %75 = vector.broadcast %73 : vector<8x16x1xf32> to vector<8x16x64xf32>
      %76 = arith.mulf %75, %74 : vector<8x16x64xf32>
      %cst_47 = arith.constant dense<0.000000e+00> : vector<8x64xf32>
      %77 = vector.multi_reduction <add>, %76, %cst_47 [1] : vector<8x16x64xf32> to vector<8x64xf32>
      %c0_48 = arith.constant 0 : index
      %c0_49 = arith.constant 0 : index
      %78 = vector.load %arg8[%c0_48, %c0_49] : memref<96x32xf32, #tpu.memory_space<vmem>>, vector<32x32xf32>
      %cst_50 = arith.constant dense<0.000000e+00> : vector<8x32xf32>
      %79 = tpu.matmul %55, %78, %cst_50 {dimension_numbers = #tpu.dot_dimension_numbers<[1], [0], [0], [1], [0, 0, 1, 1], [], []>} : vector<8x32xf32>, vector<32x32xf32>, vector<8x32xf32> -> vector<8x32xf32>
      %c32_51 = arith.constant 32 : index
      %c0_52 = arith.constant 0 : index
      %80 = vector.load %arg8[%c32_51, %c0_52] : memref<96x32xf32, #tpu.memory_space<vmem>>, vector<64x32xf32>
      %cst_53 = arith.constant dense<0.000000e+00> : vector<8x32xf32>
      %81 = tpu.matmul %77, %80, %cst_53 {dimension_numbers = #tpu.dot_dimension_numbers<[1], [0], [0], [1], [0, 0, 1, 1], [], []>} : vector<8x64xf32>, vector<64x32xf32>, vector<8x32xf32> -> vector<8x32xf32>
      %82 = arith.addf %79, %81 : vector<8x32xf32>
      %83 = math.tanh %82 : vector<8x32xf32>
      %c0_54 = arith.constant 0 : index
      %c0_55 = arith.constant 0 : index
      %84 = vector.load %arg9[%c0_54, %c0_55] : memref<32x128xf32, #tpu.memory_space<vmem>>, vector<32x128xf32>
      %cst_56 = arith.constant dense<0.000000e+00> : vector<8x128xf32>
      %85 = tpu.matmul %83, %84, %cst_56 {dimension_numbers = #tpu.dot_dimension_numbers<[1], [0], [0], [1], [0, 0, 1, 1], [], []>} : vector<8x32xf32>, vector<32x128xf32>, vector<8x128xf32> -> vector<8x128xf32>
      %cst_57 = arith.constant dense<0xFF800000> : vector<8xf32>
      %86 = vector.multi_reduction <maximumf>, %85, %cst_57 [1] : vector<8x128xf32> to vector<8xf32>
      %87 = vector.shape_cast %86 : vector<8xf32> to vector<8x1xf32>
      %88 = vector.broadcast %87 : vector<8x1xf32> to vector<8x128xf32>
      %89 = arith.subf %85, %88 : vector<8x128xf32>
      %90 = math.exp %89 : vector<8x128xf32>
      %cst_58 = arith.constant dense<0.000000e+00> : vector<8xf32>
      %91 = vector.multi_reduction <add>, %90, %cst_58 [1] : vector<8x128xf32> to vector<8xf32>
      %92 = vector.shape_cast %91 : vector<8xf32> to vector<8x1xf32>
      %93 = math.log %92 : vector<8x1xf32>
      %94 = arith.addf %87, %93 : vector<8x1xf32>
      %95 = vector.broadcast %94 : vector<8x1xf32> to vector<8x128xf32>
      %96 = arith.subf %85, %95 : vector<8x128xf32>
      %97 = arith.index_cast %arg17 : i32 to index
      %c0_59 = arith.constant 0 : index
      %c0_60 = arith.constant 0 : index
      %98 = vector.load %arg12[%97, %c0_59, %c0_60] : memref<7x8x128xf32, #tpu.memory_space<vmem>>, vector<1x8x128xf32>
      %99 = vector.shape_cast %98 : vector<1x8x128xf32> to vector<8x128xf32>
      %100 = vector.shape_cast %96 : vector<8x128xf32> to vector<1x8x128xf32>
      tpu.vector_store %arg12[%97, %c0_59, %c0_60], %100 {strides = array<i32>} : memref<7x8x128xf32, #tpu.memory_space<vmem>>, vector<1x8x128xf32>,
      %c1_i32_61 = arith.constant 1 : i32
      %101 = arith.addi %arg17, %c1_i32_61 : i32
      %102 = arith.index_cast %101 : i32 to index
      %c0_62 = arith.constant 0 : index
      %c0_63 = arith.constant 0 : index
      %103 = vector.load %arg1[%102, %c0_62, %c0_63] : memref<8x8x1xi32, #tpu.memory_space<vmem>>, vector<1x8x1xi32>
      %104 = vector.shape_cast %103 : vector<1x8x1xi32> to vector<8x1xi32>
      %105 = tpu.iota {dimensions = array<i32: 1>} : vector<8x128xi32>
      %106 = vector.broadcast %104 : vector<8x1xi32> to vector<8x128xi32>
      %107 = arith.cmpi eq, %105, %106 : vector<8x128xi32>
      %cst_64 = arith.constant 0.000000e+00 : f32
      %108 = vector.broadcast %cst_64 : f32 to vector<8x128xf32>
      %109 = arith.select %107, %96, %108 : vector<8x128xi1>, vector<8x128xf32>
      %cst_65 = arith.constant dense<0.000000e+00> : vector<8xf32>
      %110 = vector.multi_reduction <add>, %109, %cst_65 [1] : vector<8x128xf32> to vector<8xf32>
      %111 = vector.shape_cast %110 : vector<8xf32> to vector<8x1xf32>
      %c0_66 = arith.constant 0 : index
      %c0_67 = arith.constant 0 : index
      %112 = vector.load %arg13[%c0_66, %c0_67] : memref<8x1xf32, #tpu.memory_space<vmem>>, vector<8x1xf32>
      %c0_i32_68 = arith.constant 0 : i32
      %113 = vector.broadcast %c0_i32_68 : i32 to vector<8x1xi32>
      %114 = arith.cmpi ne, %104, %113 : vector<8x1xi32>
      %115 = arith.extui %114 : vector<8x1xi1> to vector<8x1xi32>
      %116 = arith.sitofp %115 : vector<8x1xi32> to vector<8x1xf32>
      %117 = arith.mulf %111, %116 : vector<8x1xf32>
      %118 = arith.addf %112, %117 : vector<8x1xf32>
      %c0_69 = arith.constant 0 : index
      %c0_70 = arith.constant 0 : index
      %119 = vector.load %arg13[%c0_69, %c0_70] : memref<8x1xf32, #tpu.memory_space<vmem>>, vector<8x1xf32>
      tpu.vector_store %arg13[%c0_69, %c0_70], %118 {strides = array<i32>} : memref<8x1xf32, #tpu.memory_space<vmem>>, vector<8x1xf32>,
      %c0_71 = arith.constant 0 : index
      %c0_72 = arith.constant 0 : index
      %120 = vector.load %arg14[%c0_71, %c0_72] : memref<8x32xf32, #tpu.memory_space<vmem>>, vector<8x32xf32>
      tpu.vector_store %arg14[%c0_71, %c0_72], %55 {strides = array<i32>} : memref<8x32xf32, #tpu.memory_space<vmem>>, vector<8x32xf32>,
      %c0_73 = arith.constant 0 : index
      %c0_74 = arith.constant 0 : index
      %121 = vector.load %arg15[%c0_73, %c0_74] : memref<8x32xf32, #tpu.memory_space<vmem>>, vector<8x32xf32>
      tpu.vector_store %arg15[%c0_73, %c0_74], %53 {strides = array<i32>} : memref<8x32xf32, #tpu.memory_space<vmem>>, vector<8x32xf32>,
      %c0_75 = arith.constant 0 : index
      %c0_76 = arith.constant 0 : index
      %122 = vector.load %arg16[%c0_75, %c0_76] : memref<8x32xf32, #tpu.memory_space<vmem>>, vector<8x32xf32>
      tpu.vector_store %arg16[%c0_75, %c0_76], %83 {strides = array<i32>} : memref<8x32xf32, #tpu.memory_space<vmem>>, vector<8x32xf32>,
    }
    %c7_i32_15 = arith.constant 7 : i32
    return
  }
}

</mosaic_0001>

<bundles_post_ra>
// kernel: seq2seq_forward.2
= control target key start
LH: loop header
LB: loop body
LE: loop exit
PB: predicated region body
PF: predicated region fallthrough
CT: control target
= control target key end

     0   :  { %vm27_vm0 = vcmask 261120   ;;  %v395_v0 = vmov 0.0   ;;  %s454_s30 = smov 0   ;;  %s591_s0 = inlined_call_operand.vmem [shape: f32[16,8,32], index: 0, kind: input, shape index: {}]   ;;  %s592_s1 = inlined_call_operand.vmem [shape: f32[16,8,1], index: 1, kind: input, shape index: {}]   ;;  %s593_s2 = inlined_call_operand.vmem [shape: f32[64,128], index: 2, kind: input, shape index: {}]   ;;  %s594_s3 = inlined_call_operand.vmem [shape: f32[64,128], index: 3, kind: input, shape index: {}]   ;;  %s595_s4 = inlined_call_operand.vmem [shape: f32[1,128], index: 4, kind: input, shape index: {}]   ;;  %s596_s5 = inlined_call_operand.vmem [shape: f32[1,128], index: 5, kind: input, shape index: {}]   ;;  %s597_s6 = inlined_call_operand.vmem [shape: f32[16,8,32], index: 6, kind: output, shape index: {0}]   ;;  %s598_s7 = inlined_call_operand.vmem [shape: f32[16,8,32], index: 7, kind: output, shape index: {1}]   ;;  %s599_s8 = inlined_call_operand.vmem [shape: f32[8,32], index: 8, kind: output, shape index: {2}]   ;;  %s600_s9 = inlined_call_operand.vmem [shape: f32[8,32], index: 9, kind: output, shape index: {3}]  }
   0x1   :  { %28 = vst.msk [vmem:[#allocation2] sm:$0xff] %vm27_vm0, %v395_v0 }
   0x2   :  { %29 = vst.msk [vmem:[#allocation3] sm:$0xff] %vm27_vm0, %v395_v0 }
   0x3   :  { %30 = vst.msk [vmem:[#allocation4] sm:$0xff] %vm27_vm0, %v395_v0 }
   0x4   :  { %31 = vst.msk [vmem:[#allocation5] sm:$0xff] %vm27_vm0, %v395_v0 }
   0x5 LB: > { %v53_v1 = vld [vmem:[%s593_s2 + $0x38] sm:$0xff]  ;;  %v52_v5 = vld [vmem:[%s593_s2 + $0x30] sm:$0xff]  ;;  %v51_v9 = vld [vmem:[%s593_s2 + $0x28] sm:$0xff]  ;;  %s487_s28 = sshll.u32 %s393_s30, 3  ;;  %s173_s29 = ssub.s32 15, %s393_s30  ;;  %v398_v42 = vmov 0   ;;  %s393_s30 = sphi %s454_s30, %s37_s30  }
   0x6   : > { %v49_v2 = vld [vmem:[%s593_s2 + $0x18] sm:$0xff]  ;;  %69 = vmatpush.msra.mxu0 %v53_v1  ;;  %v48_v6 = vld [vmem:[%s593_s2 + $0x10] sm:$0xff]  ;;  %v47_v10 = vld [vmem:[%s593_s2 + $0x8] sm:$0xff]  ;;  %s44_s18 = scalar_lea.vmem %s591_s0, %s487_s28  ;;  %s503_s19 = sshll.u32 %s173_s29, 3  ;;  %367 = vset.pattern.permute.xlu2 %v398_v42 }
   0x7   : > { %v189_v3 = vld [vmem:[%s594_s3 + $0x38] sm:$0xff]  ;;  %92 = vmatpush.msra.mxu1 %v49_v2  ;;  %v188_v7 = vld [vmem:[%s594_s3 + $0x30] sm:$0xff]  ;;  %v187_v11 = vld [vmem:[%s594_s3 + $0x28] sm:$0xff]  ;;  %s180_s26 = scalar_lea.vmem %s591_s0, %s503_s19  ;;  %s396_s12 = smov 32   ;;  %368 = vset.pattern.permute.xlu0 %v398_v42 }
   0x8   : > { %v185_v4 = vld [vmem:[%s594_s3 + $0x18] sm:$0xff]  ;;  %205 = vmatpush.msra.mxu2 %v189_v3  ;;  %v184_v8 = vld [vmem:[%s594_s3 + $0x10] sm:$0xff]  ;;  %70 = vmatpush.msra.mxu0 %v52_v5  ;;  %v183_v12 = vld [vmem:[%s594_s3 + $0x8] sm:$0xff]  ;;  %s397_s17 = smov 64   ;;  %s39_s21 = scalar_lea.vmem %s592_s1, %s487_s28 }
   0x9   : > { %228 = vmatpush.msra.mxu3 %v185_v4  ;;  %93 = vmatpush.msra.mxu1 %v48_v6  ;;  %v50_v13 = vld [vmem:[%s593_s2 + $0x20] sm:$0xff]  ;;  %v43_v21 = vld [vmem:[#allocation3] sm:$0xff]  ;;  %s399_s22 = smov 96   ;;  %s175_s25 = scalar_lea.vmem %s592_s1, %s503_s19 }
   0xa   : > { %206 = vmatpush.msra.mxu2 %v188_v7  ;;  %v46_v14 = vld [vmem:[%s593_s2] sm:$0xff]  ;;  %71 = vmatpush.msra.mxu0 %v51_v9  ;;  %v523_v19 = vld [vmem:[#allocation4] sm:$0xff]  ;;  %s171_s29 = scalar_lea.vmem %s597_s6, %s487_s28  ;;  %s307_s13 = scalar_lea.vmem %s598_s7, %s503_s19 }
   0xb   : > { %229 = vmatpush.msra.mxu3 %v184_v8  ;;  %94 = vmatpush.msra.mxu1 %v47_v10  ;;  %v186_v15 = vld [vmem:[%s594_s3 + $0x20] sm:$0xff]  ;;  %v179_v22 = vld [vmem:[#allocation5] sm:$0xff]  ;;  %s37_s30 = sadd.s32 1, %s393_s30  }
   0xc   : > { %v182_v16 = vld [vmem:[%s594_s3] sm:$0xff]  ;;  %207 = vmatpush.msra.mxu2 %v187_v11  ;;  %72 = vmatpush.msra.mxu0 %v50_v13  ;;  %p34_p0 = scmp.ge.s32.totalorder %s37_s30, 16  }
   0xd   : > { %230 = vmatpush.msra.mxu3 %v183_v12  ;;  %v521_v17 = vld [vmem:[#allocation2] sm:$0xff]  ;;  %95 = vmatpush.msra.mxu1 %v46_v14 }
   0xe   : > { %v45_v18 = vld [vmem:[%s44_s18] sm:$0xff]  ;;  %208 = vmatpush.msra.mxu2 %v186_v15  ;;  %347 = vmatmul.msk.f32.vlgmr.msra.gmra.mxu0 %vm27_vm0, %v521_v17 }
   0xf   : > { %v181_v20 = vld [vmem:[%s180_s26] sm:$0xff]  ;;  %231 = vmatpush.msra.mxu3 %v182_v16  ;;  %348 = vmatmul.msk.f32.vlgmr.msra.gmra.mxu1 %vm27_vm0, %v45_v18 }
  0x10   : > { %351 = vmatmul.msk.f32.vlgmr.msra.gmra.mxu2 %vm27_vm0, %v523_v19  ;;  %352 = vmatmul.msk.f32.vlgmr.msra.gmra.mxu3 %vm27_vm0, %v181_v20  ;;  %v369_v23 = vld [vmem:[%s595_s4] ss:$0 sm:$0xff] }
  0x11   : > { %126 = vrot.lane.b32.xlu1 %v43_v21, %s396_s12  ;;  %v370_v28 = vld [vmem:[%s596_s5] ss:$0 sm:$0xff] }
  0x12   : > { %v40_v2 = vld [vmem:[%s39_s21] sm:$0xff] }
  0x13   : > { %vm41_vm9 = vcmp.gt.f32.partialorder %v40_v2, 0.0  ;;  %v176_v13 = vld [vmem:[%s175_s25] sm:$0xff] }
  0x14   : > { %v146_v3 = vsel %vm41_vm9, 1, %v398_v42  ;;  %vm177_vm10 = vcmp.gt.f32.partialorder %v176_v13, 0.0 }
  0x15   : > { %v282_v14 = vsel %vm177_vm10, 1, %v398_v42 }
  0x19   : > { %262 = vrot.lane.b32.xlu1 %v179_v22, %s396_s12 }
  0x83   : > { %v127_v4 = vpop.permute.xlu1 %126 }
  0x8b   : > { %v74_v24 = vpop.f32.mrf.mxu0  ;;  %v263_v8 = vpop.permute.xlu1 %262 }
  0x8c   : > { %v97_v25 = vpop.f32.mrf.mxu1 }
  0x8d   : > { %v98_v26 = vadd.f32 %v97_v25, %v74_v24 }
  0x8f   : > { %v104_v27 = vadd.f32 %v369_v23, %v98_v26 }
  0x91   : > { %371 = vtanh.f32 %v104_v27  ;;  %v349_v35 = vmul.f32 -1.442695, %v104_v27 }
  0x93   : > { %v210_v29 = vpop.f32.mrf.mxu2  ;;  %v233_v30 = vpop.f32.mrf.mxu3 }
  0x94   : > { %v234_v31 = vadd.f32 %v233_v30, %v210_v29 }
  0x96   : > { %v240_v32 = vadd.f32 %v370_v28, %v234_v31 }
  0x97   : > { %v372_v33 = vpop.eup %371 }
  0x98   : > { %373 = vtanh.f32 %v240_v32  ;;  %131 = vrot.lane.b32.xlu0 %v372_v33, %s397_s17  ;;  %v353_v36 = vmul.f32 -1.442695, %v240_v32 }
  0x99   : > { %375 = vpow2.f32 %v349_v35 }
  0x9a   : > { %377 = vpow2.f32 %v353_v36 }
  0x9e   : > { %v374_v34 = vpop.eup %373 }
  0x9f   : > { %v376_v37 = vpop.eup %375 }
  0xa0   : > { %267 = vrot.lane.b32.xlu0 %v374_v34, %s397_s17  ;;  %v108_v38 = vadd.f32 1.0, %v376_v37  ;;  %v378_v39 = vpop.eup %377 }
  0xa1   : > { %v244_v40 = vadd.f32 1.0, %v378_v39 }
  0xa2   : > { %379 = vrcp.f32 %v108_v38  ;;  %v120_v50 = vand.u32 2147483648, %v108_v38  ;;  %vm114_vm2 = vweird.f32 %v108_v38  ;;  %v118_v51 = vand.u32 2147483647, %v108_v38 }
  0xa3   : > { %381 = vrcp.f32 %v244_v40  ;;  %v256_v59 = vand.u32 2147483648, %v244_v40  ;;  %vm250_vm6 = vweird.f32 %v244_v40  ;;  %v254_v60 = vand.u32 2147483647, %v244_v40 }
  0xa4   : > { %v121_v54 = vor.u32 1.1754944e-38, %v120_v50  ;;  %vm119_vm4 = vcmp.eq.f32.partialorder %v118_v51, 8.507059e+37 }
  0xa5   : > { %v257_v62 = vor.u32 1.1754944e-38, %v256_v59  ;;  %vm255_vm8 = vcmp.eq.f32.partialorder %v254_v60, 8.507059e+37 }
  0xa8   : > { %v380_v41 = vpop.eup %379 }
  0xa9   : > { %v110_v43 = vmul.f32 %v380_v41, %v108_v38  ;;  %v382_v45 = vpop.eup %381  ;;  %vm115_vm1 = vweird.f32 %v380_v41 }
  0xaa   : > { %v246_v47 = vmul.f32 %v382_v45, %v244_v40  ;;  %vm116_vm3 = vmor %vm114_vm2, %vm115_vm1  ;;  %vm251_vm5 = vweird.f32 %v382_v45 }
  0xab   : > { %v111_v44 = vsub.f32 1.0, %v110_v43  ;;  %vm252_vm7 = vmor %vm250_vm6, %vm251_vm5 }
  0xac   : > { %v247_v49 = vsub.f32 1.0, %v246_v47 }
  0xad   : > { %v112_v46 = vmul.f32 %v380_v41, %v111_v44 }
  0xae   : > { %v248_v53 = vmul.f32 %v382_v45, %v247_v49 }
  0xaf   : > { %v113_v48 = vadd.f32 %v380_v41, %v112_v46 }
  0xb0   : > { %v249_v57 = vadd.f32 %v382_v45, %v248_v53 }
  0xb1   : > { %v117_v52 = vsel %vm116_vm3, %v380_v41, %v113_v48 }
  0xb2   : > { %v122_v55 = vsel %vm119_vm4, %v121_v54, %v117_v52  ;;  %v253_v61 = vsel %vm252_vm7, %v382_v45, %v249_v57 }
  0xb3   : > { %v258_v63 = vsel %vm255_vm8, %v257_v62, %v253_v61  ;;  %v129_v5 = vmul.f32 %v127_v4, %v122_v55 }
  0xb4   : > { %v265_v9 = vmul.f32 %v263_v8, %v258_v63 }
 0x10a   : > { %v132_v56 = vpop.permute.xlu0 %131 }
 0x10b   : > { %v134_v58 = vmul.f32 %v132_v56, %v122_v55 }
 0x10d   : > { %136 = vrot.lane.b32.xlu2 %v134_v58, %s396_s12 }
 0x112   : > { %v268_v0 = vpop.permute.xlu0 %267 }
 0x113   : > { %v270_v1 = vmul.f32 %v268_v0, %v258_v63 }
 0x115   : > { %272 = vrot.lane.b32.xlu2 %v270_v1, %s396_s12 }
 0x11d   : > { %148 = vperm.xlu2 %367, %v146_v3  }
 0x125   : > { %287 = vrot.lane.b32.xlu2 %v523_v19, %s399_s22 }
 0x167   : > { %v137_v6 = vpop.permute.xlu2 %136 }
 0x168   : > { %v139_v7 = vadd.f32 %v137_v6, %v129_v5 }
 0x16a   : > { %383 = vtanh.f32 %v139_v7 }
 0x16f   : > { %v273_v10 = vpop.permute.xlu2 %272 }
 0x170   : > { %v384_v11 = vpop.eup %383  ;;  %v275_v12 = vadd.f32 %v273_v10, %v265_v9 }
 0x171   : > { %142 = vrot.lane.b32.xlu0 %v384_v11, %s397_s17 }
 0x172   : > { %385 = vtanh.f32 %v275_v12 }
 0x177   : > { %v149_v15 = vpop.permute.xlu2 %148 }
 0x178   : > { %v386_v16 = vpop.eup %385  ;;  %vm150_vm11 = vcmp.eq.s32.totalorder %v149_v15, 1 }
 0x179   : > { %278 = vrot.lane.b32.xlu1 %v386_v16, %s397_s17  ;;  %284 = vperm.xlu0 %368, %v282_v14   ;;  %v160_v18 = vsel %vm150_vm11, %v139_v7, %v127_v4 }
 0x17a   : > { %162 = vrot.lane.b32.xlu2 %v160_v18, %s399_s22 }
 0x17f   : > { %v288_v19 = vpop.permute.xlu2 %287 }
 0x181   : > { %151 = vrot.lane.b32.xlu1 %v521_v17, %s399_s22 }
 0x1d4   : > { %v163_v20 = vpop.permute.xlu2 %162 }
 0x1d5   : > { %165 = vst.msk [vmem:[#allocation3] sm:$0xff] %vm27_vm0, %v163_v20 }
 0x1dc   :  { %v309_v36 = vld [vmem:[#allocation3] sm:$0xff] (%p34_p0) }
 0x1dd   :  { %310 = vst.msk [vmem:[%s599_s8] sm:$0xff] (%p34_p0), %vm27_vm0, %v309_v36 }
 0x1e3   : > { %v143_v21 = vpop.permute.xlu0 %142 }
 0x1e4   : > { %v145_v22 = vmul.f32 %v143_v21, %v122_v55 }
 0x1e6   : > { %v166_v23 = vsel %vm150_vm11, %v145_v22, 0.0 }
 0x1e7   : > { %168 = vrot.lane.b32.xlu0 %v166_v23, %s396_s12 }
 0x1eb   : > { %v279_v24 = vpop.permute.xlu1 %278  ;;  %v285_v25 = vpop.permute.xlu0 %284 }
 0x1ec   : > { %v281_v26 = vmul.f32 %v279_v24, %v258_v63  ;;  %vm286_vm12 = vcmp.eq.s32.totalorder %v285_v25, 1 }
 0x1ed   : > { %v296_v27 = vsel %vm286_vm12, %v275_v12, %v263_v8 }
 0x1ee   : > { %298 = vrot.lane.b32.xlu2 %v296_v27, %s399_s22  ;;  %v302_v17 = vsel %vm286_vm12, %v281_v26, 0.0  ;;  %v290_v30 = vsel %vm286_vm12, %v281_v26, %v288_v19 }
 0x1ef   : > { %304 = vrot.lane.b32.xlu0 %v302_v17, %s396_s12 }
 0x1f3   : > { %v152_v28 = vpop.permute.xlu1 %151 }
 0x1f4   : > { %v154_v29 = vsel %vm150_vm11, %v145_v22, %v152_v28 }
 0x1f5   : > { %156 = vrot.lane.b32.xlu1 %v154_v29, %s396_s12 }
 0x1fd   : > { %292 = vrot.lane.b32.xlu1 %v290_v30, %s396_s12 }
 0x248   : > { %v299_v31 = vpop.permute.xlu2 %298 }
 0x249   : > { %301 = vst.msk [vmem:[#allocation5] sm:$0xff] %vm27_vm0, %v299_v31 }
 0x250   :  { %v311_v37 = vld [vmem:[#allocation5] sm:$0xff] (%p34_p0) }
 0x251   :  { %312 = vst.msk [vmem:[%s600_s9] sm:$0xff] (%p34_p0), %vm27_vm0, %v311_v37 }
 0x259   : > { %v169_v32 = vpop.permute.xlu0 %168 }
 0x25a   : > { %172 = vst.msk [vmem:[%s171_s29] sm:$0xff] %vm27_vm0, %v169_v32 }
 0x261   : > { %v305_v33 = vpop.permute.xlu0 %304 }
 0x262   : > { %308 = vst.msk [vmem:[%s307_s13] sm:$0xff] %vm27_vm0, %v305_v33 }
 0x267   : > { %v157_v34 = vpop.permute.xlu1 %156 }
 0x268   : > { %159 = vst.msk [vmem:[#allocation2] sm:$0xff] %vm27_vm0, %v157_v34 }
 0x26c   :  { %36 = sbr.rel (!%p34_p0) target bundleno = 5 (0x5), region = 81 }
 0x26f   : > { %v293_v35 = vpop.permute.xlu1 %292 }
 0x270   : > { %295 = vst.msk [vmem:[#allocation4] sm:$0xff] %vm27_vm0, %v293_v35 }

// kernel: seq2seq_forward.3
= control target key start
LH: loop header
LB: loop body
LE: loop exit
PB: predicated region body
PF: predicated region fallthrough
CT: control target
= control target key end

     0   :  { %19 = vsyncpa [#allocation6], 0  ;;  %vm57_vm0 = vcmask 523264   ;;  %vm81_vm1 = vcmask 261120   ;;  %vm86_vm2 = vcmask 7168   ;;  %v1282_v9 = vmov 0.0   ;;  %s1985_s0 = inlined_call_operand.vmem [shape: f32[8,8,32], index: 0, kind: input, shape index: {}]   ;;  %s1986_s1 = inlined_call_operand.vmem [shape: s32[8,8,1], index: 1, kind: input, shape index: {}]   ;;  %s1987_s2 = inlined_call_operand.vmem [shape: f32[8,16], index: 2, kind: input, shape index: {}]   ;;  %s1988_s3 = inlined_call_operand.vmem [shape: f32[8,64], index: 3, kind: input, shape index: {}]   ;;  %s1989_s4 = inlined_call_operand.vmem [shape: f32[64,32], index: 4, kind: input, shape index: {}]   ;;  %s1990_s5 = inlined_call_operand.vmem [shape: f32[1,32], index: 5, kind: input, shape index: {}]   ;;  %s1991_s6 = inlined_call_operand.vmem [shape: f32[96,128], index: 6, kind: input, shape index: {}]   ;;  %s1992_s7 = inlined_call_operand.vmem [shape: f32[1,128], index: 7, kind: input, shape index: {}]   ;;  %s1993_s8 = inlined_call_operand.vmem [shape: f32[96,32], index: 8, kind: input, shape index: {}]   ;;  %s1994_s9 = inlined_call_operand.vmem [shape: f32[32,128], index: 9, kind: input, shape index: {}]   ;;  %s1995_s10 = inlined_call_operand.vmem [shape: f32[8,16,64], index: 10, kind: input, shape index: {}]   ;;  %s1996_s11 = inlined_call_operand.vmem [shape: f32[8,16,32], index: 11, kind: input, shape index: {}]   ;;  %s1997_s12 = inlined_call_operand.hbm [shape: f32[7,8,128], index: 12, kind: output, shape index: {0}]   ;;  %s1998_s13 = inlined_call_operand.vmem [shape: f32[8,1], index: 13, kind: output, shape index: {1}]  }
   0x1   :  { %v52_v0 = vld [vmem:[%s1989_s4 + $0x38] sm:$0xff]  ;;  %v51_v1 = vld [vmem:[%s1989_s4 + $0x30] sm:$0xff]  ;;  %v50_v2 = vld [vmem:[%s1989_s4 + $0x28] sm:$0xff]  ;;  %85 = vst.msk [vmem:[#allocation4] sm:$0xff] %vm81_vm1, %v1282_v9 }
   0x2   :  { %69 = vmatpush.msra.mxu0 %v52_v0  ;;  %v49_v3 = vld [vmem:[%s1989_s4 + $0x20] sm:$0xff]  ;;  %v48_v4 = vld [vmem:[%s1989_s4 + $0x18] sm:$0xff]  ;;  %v47_v5 = vld [vmem:[%s1989_s4 + $0x10] sm:$0xff]  ;;  %87 = vst.msk [vmem:[%s1998_s13] sm:$0xff] %vm86_vm2, %v1282_v9 }
   0x3   :  { %v46_v6 = vld [vmem:[%s1989_s4 + $0x8] sm:$0xff]  ;;  %v45_v7 = vld [vmem:[%s1989_s4] sm:$0xff] }
   0x4   :  { %70 = vmatpush.msra.mxu0 %v51_v1  ;;  %v44_v8 = vld [vmem:[%s1988_s3] sm:$0xff]  ;;  %s1399_s3 = smov 0  }
   0x5   :  { %v1182_v10 = vld [vmem:[%s1990_s5] ss:$0 sm:$0xff] }
   0x6   :  { %71 = vmatpush.msra.mxu0 %v50_v2 }
   0x8   :  { %72 = vmatpush.msra.mxu0 %v49_v3 }
   0xa   :  { %73 = vmatpush.msra.mxu0 %v48_v4 }
   0xc   :  { %74 = vmatpush.msra.mxu0 %v47_v5 }
   0xe   :  { %75 = vmatpush.msra.mxu0 %v46_v6 }
  0x10   :  { %76 = vmatpush.msra.mxu0 %v45_v7 }
  0x11   :  { %1153 = vmatmul.msk.f32.vlgmr.msra.gmra.mxu0 %vm57_vm0, %v44_v8 }
  0x8e   :  { %v78_v11 = vpop.f32.mrf.mxu0 }
  0x8f   :  { %v79_v12 = vadd.f32 %v1182_v10, %v78_v11 }
  0x91   :  { %82 = vst.msk [vmem:[#allocation3] sm:$0xff] %vm81_vm1, %v79_v12  ;;  %1183 = vtanh.f32 %v79_v12 }
  0x97   :  { %v1184_v13 = vpop.eup %1183 }
  0x98   :  { %84 = vst.msk [vmem:[#allocation2] sm:$0xff] %vm81_vm1, %v1184_v13 }
  0x99 LB: > { %v157_v14 = vld [vmem:[%s1991_s6 + $0x58] sm:$0xff]  ;;  %v156_v15 = vld [vmem:[%s1991_s6 + $0x50] sm:$0xff]  ;;  %v155_v19 = vld [vmem:[%s1991_s6 + $0x48] sm:$0xff]  ;;  %s1426_s25 = sshll.u32 %s1280_s3, 3  ;;  %v351_v29 = vlaneseq  ;;  %s1283_s24 = smov 64   ;;  %vm555_vm7 = vcmask 130112   ;;  %s1280_s3 = sphi %s1399_s3, %s93_s3  }
  0x9a   : > { %v107_v16 = vld [vmem:[%s1991_s6 + $0x38] sm:$0xff]  ;;  %173 = vmatpush.msra.mxu2 %v157_v14  ;;  %v106_v18 = vld [vmem:[%s1991_s6 + $0x30] sm:$0xff]  ;;  %v105_v21 = vld [vmem:[%s1991_s6 + $0x28] sm:$0xff]  ;;  %s95_s5 = scalar_lea.vmem %s1985_s0, %s1426_s25  ;;  %s1284_s26 = smov 32   ;;  %vm578_vm8 = vcmask 1041409   ;;  %vm580_vm9 = vcmask 1042434  }
  0x9b   : > { %123 = vmatpush.msra.mxu0 %v107_v16  ;;  %v103_v17 = vld [vmem:[%s1991_s6 + $0x18] sm:$0xff]  ;;  %v102_v20 = vld [vmem:[%s1991_s6 + $0x10] sm:$0xff]  ;;  %v101_v22 = vld [vmem:[%s1991_s6 + $0x8] sm:$0xff]  ;;  %v1451_v30 = vshrl.u32 %v351_v29, 7  ;;  %vm582_vm10 = vcmask 1043459   ;;  %vm584_vm11 = vcmask 1044484   ;;  %s1146_s27 = scalar_lea.vmem %s1986_s1, %s1426_s25 }
  0x9c   : > { %146 = vmatpush.msra.mxu1 %v103_v17  ;;  %174 = vmatpush.msra.mxu2 %v156_v15  ;;  %v154_v23 = vld [vmem:[%s1991_s6 + $0x40] sm:$0xff]  ;;  %v97_v27 = vld [vmem:[#allocation4] sm:$0xff]  ;;  %v99_v43 = vld [vmem:[#allocation3] sm:$0xff]  ;;  %vm586_vm12 = vcmask 1045509   ;;  %vm588_vm13 = vcmask 1046534   ;;  %vm590_vm14 = vcmask 1047559  }
  0x9d   : > { %124 = vmatpush.msra.mxu0 %v106_v18  ;;  %v104_v24 = vld [vmem:[%s1991_s6 + $0x20] sm:$0xff]  ;;  %1187 = vset.pattern.permute.xlu1 %v1451_v30  ;;  %v1455_v31 = vadd.s32 8, %v1451_v30  ;;  %vm593_vm15 = vcmask 130048   ;;  %s1286_s18 = smov 96   ;;  %s1091_s19 = scalar_lea.vmem [#allocation5], %s1426_s25 }
  0x9e   : > { %147 = vmatpush.msra.mxu1 %v102_v20  ;;  %175 = vmatpush.msra.mxu2 %v155_v19  ;;  %v100_v26 = vld [vmem:[%s1991_s6] sm:$0xff]  ;;  %s93_s3 = sadd.s32 1, %s1280_s3  }
  0x9f   : > { %v98_v25 = vld [vmem:[#allocation2] sm:$0xff]  ;;  %125 = vmatpush.msra.mxu0 %v105_v21  ;;  %1185 = vset.pattern.permute.xlu2 %v1451_v30  ;;  %p90_p0 = scmp.ge.s32.totalorder %s93_s3, 7  }
  0xa0   : > { %148 = vmatpush.msra.mxu1 %v101_v22  ;;  %v96_v28 = vld [vmem:[%s95_s5] sm:$0xff]  ;;  %176 = vmatpush.msra.mxu2 %v154_v23  ;;  %s1289_s28 = smov (%p90_p0), 128   ;;  %s1290_s29 = smov (%p90_p0), 8  }
  0xa1   : > { %126 = vmatpush.msra.mxu0 %v104_v24  ;;  %1157 = vmatmul.msk.f32.vlgmr.msra.gmra.mxu2 %vm81_vm1, %v98_v25  ;;  %v1461_v32 = vld [vmem:[%s1987_s2] sm:$0xff] }
  0xa2   : > { %149 = vmatpush.msra.mxu1 %v100_v26  ;;  %1155 = vmatmul.msk.f32.vlgmr.msra.gmra.mxu0 %vm81_vm1, %v97_v27  ;;  %v363_v35 = vperm.slane %v1461_v32, 1  ;;  %v1199_v37 = vld [vmem:[%s1992_s7] ss:$0 sm:$0xff]  ;;  %v389_v42 = vperm.slane %v1461_v32, 3  ;;  %v415_v44 = vperm.slane %v1461_v32, 5  ;;  %v428_v45 = vperm.slane %v1461_v32, 6 }
  0xa3   : > { %1156 = vmatmul.msk.f32.vlgmr.msra.gmra.mxu1 %vm81_vm1, %v96_v28  ;;  %1186 = vset.pattern.permute.xlu0 %v1455_v31  ;;  %v441_v46 = vperm.slane %v1461_v32, 7  ;;  %v350_v2 = vperm.slane %v1461_v32, 0  ;;  %v376_v4 = vperm.slane %v1461_v32, 2  ;;  %v402_v10 = vperm.slane %v1461_v32, 4 }
  0xa5   : > { %368 = vperm.xlu1 %1187, %v363_v35  }
  0xa7   : > { %355 = vperm.xlu2 %1185, %v350_v2  }
  0xad   : > { %1191 = vset.pattern.permute.xlu1 %v1455_v31 }
  0xaf   : > { %1188 = vset.pattern.permute.xlu2 %v1455_v31 }
  0xb5   : > { %400 = vperm.xlu1 %1191, %v389_v42  }
  0xb7   : > { %374 = vperm.xlu2 %1188, %v363_v35  }
  0xbd   : > { %426 = vperm.xlu1 %1191, %v415_v44  }
  0xbf   : > { %1190 = vset.pattern.permute.xlu2 %v1451_v30 }
  0xc5   : > { %1193 = vset.pattern.permute.xlu1 %v1451_v30 }
  0xc7   : > { %394 = vperm.xlu2 %1190, %v389_v42  }
  0xcd   : > { %433 = vperm.xlu1 %1193, %v428_v45  }
  0xcf   : > { %1192 = vset.pattern.permute.xlu2 %v1455_v31 }
  0xd5   : > { %1194 = vset.pattern.permute.xlu1 %v1455_v31 }
  0xd7   : > { %413 = vperm.xlu2 %1192, %v402_v10  }
  0xdd   : > { %439 = vperm.xlu1 %1194, %v428_v45   ;;  %v230_v45 = vld [vmem:[%s1996_s11 + $0x10] sm:$0xff] }
  0xdf   : > { %452 = vperm.xlu2 %1192, %v441_v46  }
  0xe5   : > { %1195 = vset.pattern.permute.xlu1 %v1451_v30 }
  0xed   : > { %446 = vperm.xlu1 %1195, %v441_v46  }
 0x117   : > { %v1479_v62 = vpop.permute.xlu1 %368 }
 0x11f   : > { %v128_v33 = vpop.f32.mrf.mxu0 }
 0x120   : > { %v151_v34 = vpop.f32.mrf.mxu1 }
 0x121   : > { %v152_v36 = vadd.f32 %v151_v34, %v128_v33 }
 0x124   : > { %v178_v38 = vpop.f32.mrf.mxu2 }
 0x125   : > { %v181_v39 = vadd.f32 %v178_v38, %v152_v36  ;;  %v229_v38 = vld [vmem:[%s1996_s11 + $0x8] sm:$0xff] }
 0x127   : > { %v186_v40 = vadd.f32 %v1199_v37, %v181_v39  ;;  %v1481_v63 = vpop.permute.xlu1 %400  ;;  %v228_v39 = vld [vmem:[%s1996_s11] sm:$0xff] }
 0x129   : > { %1200 = vtanh.f32 %v186_v40  ;;  %v1158_v47 = vmul.f32 -1.442695, %v186_v40 }
 0x12b   : > { %1202 = vpow2.f32 %v1158_v47 }
 0x12f   : > { %v1201_v41 = vpop.eup %1200  ;;  %v1483_v0 = vpop.permute.xlu1 %426 }
 0x130   : > { %213 = vrot.lane.b32.xlu0 %v1201_v41, %s1283_s24 }
 0x131   : > { %v1203_v48 = vpop.eup %1202 }
 0x132   : > { %v190_v49 = vadd.f32 1.0, %v1203_v48 }
 0x134   : > { %1204 = vrcp.f32 %v190_v49  ;;  %v202_v55 = vand.u32 2147483648, %v190_v49  ;;  %vm196_vm4 = vweird.f32 %v190_v49  ;;  %v200_v56 = vand.u32 2147483647, %v190_v49 }
 0x136   : > { %v203_v58 = vor.u32 1.1754944e-38, %v202_v55  ;;  %vm201_vm6 = vcmp.eq.f32.partialorder %v200_v56, 8.507059e+37  ;;  %v232_v55 = vld [vmem:[%s1996_s11 + $0x20] sm:$0xff]  ;;  %v235_v56 = vld [vmem:[%s1996_s11 + $0x38] sm:$0xff] }
 0x138   : > { %208 = vrot.lane.b32.xlu0 %v99_v43, %s1284_s26 }
 0x13a   : > { %v1205_v50 = vpop.eup %1204 }
 0x13b   : > { %v192_v51 = vmul.f32 %v1205_v50, %v190_v49  ;;  %vm197_vm3 = vweird.f32 %v1205_v50 }
 0x13c   : > { %vm198_vm5 = vmor %vm196_vm4, %vm197_vm3 }
 0x13d   : > { %v193_v52 = vsub.f32 1.0, %v192_v51 }
 0x13f   : > { %v194_v53 = vmul.f32 %v1205_v50, %v193_v52  ;;  %v1485_v1 = vpop.permute.xlu1 %433 }
 0x140   : > { %361 = vperm.xlu0 %1186, %v350_v2  }
 0x141   : > { %v195_v54 = vadd.f32 %v1205_v50, %v194_v53 }
 0x143   : > { %v199_v57 = vsel %vm198_vm5, %v1205_v50, %v195_v54  ;;  %v231_v50 = vld [vmem:[%s1996_s11 + $0x18] sm:$0xff]  ;;  %v233_v54 = vld [vmem:[%s1996_s11 + $0x28] sm:$0xff] }
 0x144   : > { %v204_v60 = vsel %vm201_vm6, %v203_v58, %v199_v57 }
 0x148   : > { %387 = vperm.xlu0 %1186, %v376_v4  }
 0x14f   : > { %v1488_v3 = vpop.permute.xlu1 %439 }
 0x150   : > { %1189 = vset.pattern.permute.xlu0 %v1451_v30  ;;  %v1520_v30 = vpop.permute.xlu2 %355 }
 0x158   : > { %381 = vperm.xlu0 %1189, %v376_v4   ;;  %v1522_v31 = vpop.permute.xlu2 %374 }
 0x15f   : > { %v1492_v5 = vpop.permute.xlu1 %446 }
 0x160   : > { %407 = vperm.xlu0 %1189, %v402_v10   ;;  %v1524_v32 = vpop.permute.xlu2 %394  ;;  %v237_v10 = vld [vmem:[%s1996_s11 + $0x48] sm:$0xff] }
 0x168   : > { %420 = vperm.xlu0 %1189, %v415_v44   ;;  %v1528_v34 = vpop.permute.xlu2 %413 }
 0x170   : > { %v1532_v36 = vpop.permute.xlu2 %452 }
 0x1a2   : > { %v214_v59 = vpop.permute.xlu0 %213 }
 0x1a3   : > { %v216_v61 = vmul.f32 %v214_v59, %v204_v60 }
 0x1a5   : > { %218 = vrot.lane.b32.xlu1 %v216_v61, %s1284_s26 }
 0x1aa   : > { %v209_v6 = vpop.permute.xlu0 %208 }
 0x1ab   : > { %v211_v7 = vmul.f32 %v209_v6, %v204_v60 }
 0x1b2   : > { %v1526_v33 = vpop.permute.xlu0 %361 }
 0x1ba   : > { %v1530_v35 = vpop.permute.xlu0 %387 }
 0x1ca   : > { %v1534_v37 = vpop.permute.xlu0 %381 }
 0x1d2   : > { %v1547_v46 = vpop.permute.xlu0 %407 }
 0x1da   : > { %v1553_v52 = vpop.permute.xlu0 %420 }
 0x217   : > { %v219_v8 = vpop.permute.xlu1 %218 }
 0x218   : > { %v1495_v9 = vadd.f32 %v219_v8, %v211_v7  ;;  %v234_v8 = vld [vmem:[%s1996_s11 + $0x30] sm:$0xff] }
 0x21a   : > { %1206 = vtanh.f32 %v1495_v9 }
 0x220   : > { %v1207_v11 = vpop.eup %1206 }
 0x221   : > { %224 = vrot.lane.b32.xlu1 %v1207_v11, %s1283_s24  ;;  %v238_v11 = vld [vmem:[%s1996_s11 + $0x50] sm:$0xff] }
 0x293   : > { %v225_v12 = vpop.permute.xlu1 %224 }
 0x294   : > { %v1502_v13 = vmul.f32 %v225_v12, %v204_v60 }
 0x296   : > { %v252_v14 = vperm.slane %v1502_v13, 0  ;;  %v247_v15 = vrot.slane %v1502_v13, 3  ;;  %v246_v16 = vrot.slane %v1502_v13, 2  ;;  %v245_v19 = vrot.slane %v1502_v13, 1 }
 0x297   : > { %v250_v20 = vrot.slane %v1502_v13, 6  ;;  %v249_v21 = vrot.slane %v1502_v13, 5  ;;  %v248_v25 = vrot.slane %v1502_v13, 4  ;;  %v251_v27 = vrot.slane %v1502_v13, 7 }
 0x298   : > { %260 = vrot.lane.b32.xlu2 %v252_v14, %s1284_s26  ;;  %v255_v17 = vperm.slane %v247_v15, 0  ;;  %v254_v18 = vperm.slane %v246_v16, 0  ;;  %v253_v22 = vperm.slane %v245_v19, 0 }
 0x299   : > { %v258_v23 = vperm.slane %v250_v20, 0  ;;  %v257_v24 = vperm.slane %v249_v21, 0  ;;  %v256_v26 = vperm.slane %v248_v25, 0  ;;  %v259_v28 = vperm.slane %v251_v27, 0  ;;  %v236_v21 = vld [vmem:[%s1996_s11 + $0x40] sm:$0xff] }
 0x29a   : > { %266 = vrot.lane.b32.xlu1 %v255_v17, %s1284_s26  ;;  %264 = vrot.lane.b32.xlu0 %v254_v18, %s1284_s26 }
 0x2a0   : > { %262 = vrot.lane.b32.xlu2 %v253_v22, %s1284_s26  ;;  %v243_v22 = vld [vmem:[%s1996_s11 + $0x78] sm:$0xff] }
 0x2a2   : > { %272 = vrot.lane.b32.xlu1 %v258_v23, %s1284_s26  ;;  %270 = vrot.lane.b32.xlu0 %v257_v24, %s1284_s26  ;;  %v242_v23 = vld [vmem:[%s1996_s11 + $0x70] sm:$0xff] }
 0x2a8   : > { %268 = vrot.lane.b32.xlu2 %v256_v26, %s1284_s26 }
 0x2b0   : > { %274 = vrot.lane.b32.xlu2 %v259_v28, %s1284_s26 }
 0x2f2   : > { %v261_v40 = vpop.permute.xlu2 %260 }
 0x2f3   : > { %v285_v41 = vmul.f32 %v261_v40, %v229_v38  ;;  %v284_v42 = vmul.f32 %v261_v40, %v228_v39  ;;  %v239_v39 = vld [vmem:[%s1996_s11 + $0x58] sm:$0xff] }
 0x2f5   : > { %v303_v43 = vsel %vm81_vm1, %v285_v41, 0.0  ;;  %v300_v44 = vsel %vm81_vm1, %v284_v42, 0.0 }
 0x2f6   : > { %304 = vadd.xlane.f32.xlu1 %v303_v43  ;;  %301 = vadd.xlane.f32.xlu0 %v300_v44  ;;  %v240_v43 = vld [vmem:[%s1996_s11 + $0x60] sm:$0xff] }
 0x2fa   : > { %v263_v47 = vpop.permute.xlu2 %262 }
 0x2fb   : > { %v286_v48 = vmul.f32 %v263_v47, %v230_v45  ;;  %v287_v51 = vmul.f32 %v263_v47, %v231_v50  ;;  %v241_v47 = vld [vmem:[%s1996_s11 + $0x68] sm:$0xff]  ;;  %v1285_v50 = vmov 0  }
 0x2fc   : > { %1197 = vset.pattern.permute.xlu1 %v1285_v50  ;;  %1196 = vset.pattern.permute.xlu0 %v1285_v50 }
 0x2fd   : > { %v306_v49 = vsel %vm81_vm1, %v286_v48, 0.0  ;;  %v309_v53 = vsel %vm81_vm1, %v287_v51, 0.0  ;;  %1198 = vset.pattern.permute.xlu2 %v1285_v50 }
 0x2fe   : > { %307 = vadd.xlane.f32.xlu2 %v306_v49 }
 0x302   : > { %v269_v2 = vpop.permute.xlu2 %268 }
 0x303   : > { %v293_v14 = vmul.f32 %v269_v2, %v237_v10  ;;  %v292_v24 = vmul.f32 %v269_v2, %v236_v21 }
 0x305   : > { %v327_v19 = vsel %vm81_vm1, %v293_v14, 0.0  ;;  %v324_v27 = vsel %vm81_vm1, %v292_v24, 0.0 }
 0x306   : > { %310 = vadd.xlane.f32.xlu2 %v309_v53 }
 0x30a   : > { %v275_v20 = vpop.permute.xlu2 %274 }
 0x30b   : > { %v299_v25 = vmul.f32 %v275_v20, %v243_v22  ;;  %v298_v26 = vmul.f32 %v275_v20, %v242_v23  ;;  %v1669_v23 = vand.u32 127, %v351_v29 }
 0x30c   : > { %v267_v57 = vpop.permute.xlu1 %266  ;;  %v265_v58 = vpop.permute.xlu0 %264 }
 0x30d   : > { %v289_v59 = vmul.f32 %v265_v58, %v233_v54  ;;  %v288_v60 = vmul.f32 %v265_v58, %v232_v55  ;;  %v291_v61 = vmul.f32 %v267_v57, %v235_v56  ;;  %v290_v12 = vmul.f32 %v267_v57, %v234_v8 }
 0x30e   : > { %v345_v28 = vsel %vm81_vm1, %v299_v25, 0.0  ;;  %v342_v38 = vsel %vm81_vm1, %v298_v26, 0.0 }
 0x30f   : > { %v315_v4 = vsel %vm81_vm1, %v289_v59, 0.0  ;;  %v312_v6 = vsel %vm81_vm1, %v288_v60, 0.0  ;;  %v321_v7 = vsel %vm81_vm1, %v291_v61, 0.0  ;;  %v318_v17 = vsel %vm81_vm1, %v290_v12, 0.0 }
 0x310   : > { %316 = vadd.xlane.f32.xlu1 %v315_v4  ;;  %313 = vadd.xlane.f32.xlu0 %v312_v6 }
 0x311   : > { %322 = vadd.xlane.f32.xlu2 %v321_v7 }
 0x314   : > { %v271_v15 = vpop.permute.xlu0 %270  ;;  %v273_v42 = vpop.permute.xlu1 %272 }
 0x315   : > { %v294_v16 = vmul.f32 %v271_v15, %v238_v11  ;;  %v295_v40 = vmul.f32 %v271_v15, %v239_v39  ;;  %v296_v44 = vmul.f32 %v273_v42, %v240_v43  ;;  %v297_v48 = vmul.f32 %v273_v42, %v241_v47 }
 0x317   : > { %v330_v18 = vsel %vm81_vm1, %v294_v16, 0.0  ;;  %v333_v41 = vsel %vm81_vm1, %v295_v40, 0.0  ;;  %v336_v45 = vsel %vm81_vm1, %v296_v44, 0.0  ;;  %v339_v49 = vsel %vm81_vm1, %v297_v48, 0.0 }
 0x318   : > { %319 = vadd.xlane.f32.xlu1 %v318_v17  ;;  %328 = vadd.xlane.f32.xlu0 %v327_v19 }
 0x319   : > { %331 = vadd.xlane.f32.xlu2 %v330_v18 }
 0x320   : > { %325 = vadd.xlane.f32.xlu1 %v324_v27  ;;  %346 = vadd.xlane.f32.xlu0 %v345_v28 }
 0x321   : > { %343 = vadd.xlane.f32.xlu2 %v342_v38 }
 0x328   : > { %334 = vadd.xlane.f32.xlu1 %v333_v41 }
 0x330   : > { %337 = vadd.xlane.f32.xlu1 %v336_v45 }
 0x338   : > { %340 = vadd.xlane.f32.xlu1 %v339_v49 }
 0x369   : > { %v305_v51 = vpop.xlane.xlu1 %304  ;;  %v302_v53 = vpop.xlane.xlu0 %301 }
 0x36a   : > { %v1605_v54 = vadd.f32 %v1526_v33, %v305_v51  ;;  %v1608_v55 = vadd.f32 %v1520_v30, %v302_v53 }
 0x36c   : > { %506 = vperm.xlu1 %1197, %v1605_v54   ;;  %503 = vperm.xlu0 %1196, %v1608_v55  }
 0x371   : > { %v308_v56 = vpop.xlane.xlu2 %307 }
 0x372   : > { %v1613_v57 = vadd.f32 %v1479_v62, %v308_v56 }
 0x374   : > { %509 = vperm.xlu1 %1197, %v1613_v57  }
 0x379   : > { %v311_v58 = vpop.xlane.xlu2 %310 }
 0x37a   : > { %v1617_v59 = vadd.f32 %v1522_v31, %v311_v58 }
 0x37c   : > { %512 = vperm.xlu1 %1197, %v1617_v59  }
 0x383   : > { %v317_v33 = vpop.xlane.xlu1 %316  ;;  %v314_v60 = vpop.xlane.xlu0 %313 }
 0x384   : > { %v1621_v30 = vadd.f32 %v1530_v35, %v317_v33  ;;  %v1624_v61 = vadd.f32 %v1534_v37, %v314_v60  ;;  %v323_v62 = vpop.xlane.xlu2 %322 }
 0x385   : > { %v1635_v7 = vadd.f32 %v1481_v63, %v323_v62 }
 0x386   : > { %515 = vperm.xlu2 %1198, %v1624_v61   ;;  %518 = vperm.xlu1 %1197, %v1621_v30  }
 0x38b   : > { %v320_v2 = vpop.xlane.xlu1 %319  ;;  %v329_v4 = vpop.xlane.xlu0 %328 }
 0x38c   : > { %v1629_v31 = vadd.f32 %v1524_v32, %v320_v2  ;;  %v1632_v6 = vadd.f32 %v1528_v34, %v329_v4  ;;  %v332_v35 = vpop.xlane.xlu2 %331 }
 0x38d   : > { %v1644_v32 = vadd.f32 %v1553_v52, %v332_v35 }
 0x38e   : > { %530 = vperm.xlu0 %1196, %v1632_v6   ;;  %521 = vperm.xlu2 %1198, %v1629_v31  }
 0x38f   : > { %524 = vperm.xlu1 %1197, %v1635_v7  }
 0x393   : > { %v326_v37 = vpop.xlane.xlu1 %325  ;;  %v347_v52 = vpop.xlane.xlu0 %346 }
 0x394   : > { %v1641_v8 = vadd.f32 %v1547_v46, %v326_v37  ;;  %v344_v10 = vpop.xlane.xlu2 %343  ;;  %v1661_v15 = vadd.f32 %v1532_v36, %v347_v52 }
 0x395   : > { %v1653_v12 = vadd.f32 %v1492_v5, %v344_v10 }
 0x396   : > { %527 = vperm.xlu2 %1198, %v1641_v8  }
 0x397   : > { %533 = vperm.xlu1 %1197, %v1644_v32  }
 0x39b   : > { %v335_v63 = vpop.xlane.xlu1 %334 }
 0x39c   : > { %v1649_v34 = vadd.f32 %v1483_v0, %v335_v63 }
 0x39e   : > { %536 = vperm.xlu2 %1198, %v1649_v34  }
 0x3a3   : > { %v338_v11 = vpop.xlane.xlu1 %337 }
 0x3a4   : > { %v1656_v46 = vadd.f32 %v1485_v1, %v338_v11 }
 0x3a6   : > { %539 = vperm.xlu0 %1196, %v1656_v46   ;;  %545 = vperm.xlu2 %1198, %v1653_v12  }
 0x3ab   : > { %v341_v14 = vpop.xlane.xlu1 %340 }
 0x3ac   : > { %v1664_v0 = vadd.f32 %v1488_v3, %v341_v14  ;;  %v1672_v3 = vadd.s32 4294967288, %v1669_v23 }
 0x3ae   : > { %548 = vperm.xlu0 %1196, %v1661_v15   ;;  %542 = vperm.xlu1 %1197, %v1664_v0  }
 0x3de   : > { %v507_v5 = vpop.permute.xlu1 %506  ;;  %v504_v20 = vpop.permute.xlu0 %503 }
 0x3df   : > { %v554_v27 = vperm.slane %v507_v5, %v1672_v3  ;;  %v552_v28 = vperm.slane %v504_v20, %v1669_v23 }
 0x3e0   : > { %v516_v1 = vpop.permute.xlu2 %515 }
 0x3e1   : > { %v560_v41 = vperm.slane %v516_v1, %v1669_v23  ;;  %v556_v47 = vsel %vm555_vm7, %v554_v27, %v552_v28 }
 0x3e6   : > { %v510_v16 = vpop.permute.xlu1 %509 }
 0x3e7   : > { %v557_v38 = vperm.slane %v510_v16, %v1669_v23 }
 0x3e8   : > { %v522_v18 = vpop.permute.xlu2 %521 }
 0x3e9   : > { %v563_v42 = vperm.slane %v522_v18, %v1669_v23 }
 0x3ee   : > { %v513_v17 = vpop.permute.xlu1 %512 }
 0x3ef   : > { %v558_v25 = vperm.slane %v513_v17, %v1672_v3 }
 0x3f0   : > { %v528_v21 = vpop.permute.xlu2 %527 }
 0x3f1   : > { %v559_v43 = vsel %vm555_vm7, %v558_v25, %v557_v38  ;;  %v566_v51 = vperm.slane %v528_v21, %v1669_v23 }
 0x3f2   : > { %v579_v50 = vsel %vm578_vm8, %v559_v43, %v556_v47 }
 0x3f8   : > { %v519_v19 = vpop.permute.xlu1 %518  ;;  %v537_v24 = vpop.permute.xlu2 %536 }
 0x3f9   : > { %v561_v26 = vperm.slane %v519_v19, %v1672_v3  ;;  %v570_v58 = vperm.slane %v537_v24, %v1672_v3 }
 0x3fb   : > { %v562_v44 = vsel %vm555_vm7, %v561_v26, %v560_v41 }
 0x3fc   : > { %v581_v56 = vsel %vm580_vm9, %v562_v44, %v579_v50 }
 0x400   : > { %v531_v36 = vpop.permute.xlu0 %530  ;;  %v546_v53 = vpop.permute.xlu2 %545 }
 0x401   : > { %v525_v22 = vpop.permute.xlu1 %524  ;;  %v567_v45 = vperm.slane %v531_v36, %v1672_v3  ;;  %v575_v62 = vperm.slane %v546_v53, %v1669_v23 }
 0x402   : > { %v564_v39 = vperm.slane %v525_v22, %v1672_v3 }
 0x403   : > { %v568_v33 = vsel %vm555_vm7, %v567_v45, %v566_v51 }
 0x404   : > { %v565_v48 = vsel %vm555_vm7, %v564_v39, %v563_v42 }
 0x405   : > { %v583_v60 = vsel %vm582_vm10, %v565_v48, %v581_v56 }
 0x406   : > { %v585_v11 = vsel %vm584_vm11, %v568_v33, %v583_v60 }
 0x409   : > { %v534_v40 = vpop.permute.xlu1 %533 }
 0x40a   : > { %v569_v49 = vperm.slane %v534_v40, %v1669_v23 }
 0x40c   : > { %v571_v2 = vsel %vm555_vm7, %v570_v58, %v569_v49 }
 0x40d   : > { %v587_v5 = vsel %vm586_vm12, %v571_v2, %v585_v11 }
 0x418   : > { %v540_v29 = vpop.permute.xlu0 %539 }
 0x419   : > { %v572_v37 = vperm.slane %v540_v29, %v1669_v23 }
 0x420   : > { %v549_v4 = vpop.permute.xlu0 %548  ;;  %v543_v35 = vpop.permute.xlu1 %542 }
 0x421   : > { %v576_v63 = vperm.slane %v549_v4, %v1672_v3  ;;  %v573_v10 = vperm.slane %v543_v35, %v1672_v3 }
 0x423   : > { %v574_v52 = vsel %vm555_vm7, %v573_v10, %v572_v37  ;;  %v577_v14 = vsel %vm555_vm7, %v576_v63, %v575_v62 }
 0x424   : > { %v589_v16 = vsel %vm588_vm13, %v574_v52, %v587_v5 }
 0x425   : > { %v591_v1 = vsel %vm590_vm14, %v577_v14, %v589_v16 }
 0x426   : > { %v594_v17 = vsel %vm593_vm15, %v591_v1, -inf }
 0x427   : > { %595 = vmax.xlane.f32.xlu1 %v594_v17 }
 0x49a   : > { %v1706_v18 = vpop.xlane.xlu1 %595 }
 0x49b   : > { %v603_v19 = vperm.slane %v1706_v18, 5  ;;  %v598_v20 = vperm.slane %v1706_v18, 0  ;;  %v599_v24 = vperm.slane %v1706_v18, 1  ;;  %v600_v40 = vperm.slane %v1706_v18, 2 }
 0x49c   : > { %v601_v42 = vperm.slane %v1706_v18, 3 }
 0x49d   : > { %v624_v21 = vsub.f32 %v1644_v32, %v603_v19  ;;  %v615_v22 = vsub.f32 %v1605_v54, %v598_v20  ;;  %v614_v36 = vsub.f32 %v1608_v55, %v598_v20  ;;  %v617_v28 = vsub.f32 %v1617_v59, %v599_v24 }
 0x49e   : > { %v616_v38 = vsub.f32 %v1613_v57, %v599_v24  ;;  %v619_v59 = vsub.f32 %v1621_v30, %v600_v40  ;;  %v618_v57 = vsub.f32 %v1624_v61, %v600_v40  ;;  %v621_v47 = vsub.f32 %v1635_v7, %v601_v42 }
 0x49f   : > { %v650_v25 = vmul.f32 1.442695, %v624_v21  ;;  %v632_v26 = vmul.f32 1.442695, %v615_v22  ;;  %v630_v27 = vmul.f32 1.442695, %v614_v36  ;;  %v620_v30 = vsub.f32 %v1629_v31, %v601_v42 }
 0x4a0   : > { %v636_v39 = vmul.f32 1.442695, %v617_v28  ;;  %v634_v54 = vmul.f32 1.442695, %v616_v38  ;;  %v640_v41 = vmul.f32 1.442695, %v619_v59 }
 0x4a1   : > { %1208 = vpow2.f32 %v650_v25  ;;  %v638_v43 = vmul.f32 1.442695, %v618_v57  ;;  %v644_v48 = vmul.f32 1.442695, %v621_v47  ;;  %v602_v61 = vperm.slane %v1706_v18, 4 }
 0x4a2   : > { %1210 = vpow2.f32 %v632_v26  ;;  %v642_v49 = vmul.f32 1.442695, %v620_v30  ;;  %v604_v31 = vperm.slane %v1706_v18, 6 }
 0x4a3   : > { %1212 = vpow2.f32 %v630_v27  ;;  %v623_v53 = vsub.f32 %v1632_v6, %v602_v61  ;;  %v622_v7 = vsub.f32 %v1641_v8, %v602_v61  ;;  %v625_v6 = vsub.f32 %v1649_v34, %v603_v19 }
 0x4a4   : > { %1214 = vpow2.f32 %v636_v39  ;;  %v626_v62 = vsub.f32 %v1656_v46, %v604_v31  ;;  %v605_v8 = vperm.slane %v1706_v18, 7  ;;  %v627_v46 = vsub.f32 %v1664_v0, %v604_v31 }
 0x4a5   : > { %1216 = vpow2.f32 %v634_v54  ;;  %v648_v56 = vmul.f32 1.442695, %v623_v53  ;;  %v646_v58 = vmul.f32 1.442695, %v622_v7  ;;  %v652_v4 = vmul.f32 1.442695, %v625_v6 }
 0x4a6   : > { %1218 = vpow2.f32 %v640_v41  ;;  %v654_v2 = vmul.f32 1.442695, %v626_v62  ;;  %v628_v63 = vsub.f32 %v1653_v12, %v605_v8  ;;  %v656_v34 = vmul.f32 1.442695, %v627_v46 }
 0x4a7   : > { %v1717_v32 = vpop.eup %1208  ;;  %1220 = vpow2.f32 %v638_v43  ;;  %v629_v14 = vsub.f32 %v1661_v15, %v605_v8 }
 0x4a8   : > { %v1719_v29 = vpop.eup %1210  ;;  %709 = vperm.xlu1 %1197, %v1717_v32   ;;  %1222 = vpow2.f32 %v644_v48  ;;  %v658_v10 = vmul.f32 1.442695, %v628_v63 }
 0x4a9   : > { %v1722_v55 = vpop.eup %1212  ;;  %682 = vperm.xlu0 %1196, %v1719_v29   ;;  %1224 = vpow2.f32 %v642_v49  ;;  %v660_v5 = vmul.f32 1.442695, %v629_v14 }
 0x4aa   : > { %679 = vperm.xlu2 %1198, %v1722_v55   ;;  %v1729_v44 = vpop.eup %1214  ;;  %1226 = vpow2.f32 %v648_v56 }
 0x4ab   : > { %v1731_v45 = vpop.eup %1216  ;;  %1228 = vpow2.f32 %v646_v58 }
 0x4ac   : > { %v1738_v50 = vpop.eup %1218  ;;  %1230 = vpow2.f32 %v654_v2 }
 0x4ad   : > { %v1740_v51 = vpop.eup %1220  ;;  %1232 = vpow2.f32 %v652_v4 }
 0x4ae   : > { %v1747_v33 = vpop.eup %1222  ;;  %1234 = vpow2.f32 %v658_v10 }
 0x4af   : > { %v1749_v60 = vpop.eup %1224  ;;  %1236 = vpow2.f32 %v656_v34 }
 0x4b0   : > { %v1756_v35 = vpop.eup %1226  ;;  %1238 = vpow2.f32 %v660_v5 }
 0x4b1   : > { %688 = vperm.xlu0 %1196, %v1729_v44   ;;  %v1758_v37 = vpop.eup %1228 }
 0x4b2   : > { %685 = vperm.xlu2 %1198, %v1731_v45   ;;  %v1764_v11 = vpop.eup %1230 }
 0x4b3   : > { %v1766_v52 = vpop.eup %1232 }
 0x4b4   : > { %v1771_v16 = vpop.eup %1234 }
 0x4b5   : > { %v1773_v12 = vpop.eup %1236 }
 0x4b6   : > { %v1777_v0 = vpop.eup %1238 }
 0x4b9   : > { %694 = vperm.xlu0 %1196, %v1738_v50  }
 0x4ba   : > { %691 = vperm.xlu2 %1198, %v1740_v51  }
 0x4c1   : > { %700 = vperm.xlu0 %1196, %v1747_v33  }
 0x4c2   : > { %697 = vperm.xlu2 %1198, %v1749_v60  }
 0x4c9   : > { %706 = vperm.xlu0 %1196, %v1756_v35  }
 0x4ca   : > { %703 = vperm.xlu2 %1198, %v1758_v37  }
 0x4d1   : > { %715 = vperm.xlu0 %1196, %v1764_v11  }
 0x4d2   : > { %712 = vperm.xlu2 %1198, %v1766_v52  }
 0x4d9   : > { %721 = vperm.xlu0 %1196, %v1771_v16  }
 0x4da   : > { %718 = vperm.xlu2 %1198, %v1773_v12  }
 0x4e2   : > { %724 = vperm.xlu2 %1198, %v1777_v0  }
 0x504   : > { %v680_v1 = vpop.permute.xlu2 %679 }
 0x505   : > { %v726_v41 = vperm.slane %v680_v1, %v1669_v23 }
 0x50c   : > { %v686_v17 = vpop.permute.xlu2 %685 }
 0x50d   : > { %v729_v38 = vperm.slane %v686_v17, %v1669_v23 }
 0x514   : > { %v692_v18 = vpop.permute.xlu2 %691 }
 0x515   : > { %v732_v54 = vperm.slane %v692_v18, %v1669_v23 }
 0x51a   : > { %v710_v49 = vpop.permute.xlu1 %709 }
 0x51b   : > { %v683_v19 = vpop.permute.xlu0 %682  ;;  %v741_v8 = vperm.slane %v710_v49, %v1669_v23  ;;  %v795_v49 = vld [vmem:[%s1995_s10] sm:$0xff] }
 0x51c   : > { %v698_v20 = vpop.permute.xlu2 %697  ;;  %v727_v39 = vperm.slane %v683_v19, %v1672_v3 }
 0x51d   : > { %v735_v42 = vperm.slane %v698_v20, %v1669_v23 }
 0x51e   : > { %v728_v48 = vsel %vm555_vm7, %v727_v39, %v726_v41 }
 0x523   : > { %v689_v15 = vpop.permute.xlu0 %688 }
 0x524   : > { %v704_v21 = vpop.permute.xlu2 %703  ;;  %v730_v27 = vperm.slane %v689_v15, %v1672_v3 }
 0x525   : > { %v738_v47 = vperm.slane %v704_v21, %v1669_v23 }
 0x526   : > { %v731_v43 = vsel %vm555_vm7, %v730_v27, %v729_v38 }
 0x527   : > { %v750_v53 = vsel %vm578_vm8, %v731_v43, %v728_v48 }
 0x52b   : > { %v695_v22 = vpop.permute.xlu0 %694 }
 0x52c   : > { %v713_v24 = vpop.permute.xlu2 %712  ;;  %v733_v28 = vperm.slane %v695_v22, %v1672_v3 }
 0x52d   : > { %v742_v58 = vperm.slane %v713_v24, %v1672_v3 }
 0x52e   : > { %v734_v30 = vsel %vm555_vm7, %v733_v28, %v732_v54 }
 0x52f   : > { %v751_v31 = vsel %vm580_vm9, %v734_v30, %v750_v53  ;;  %v743_v10 = vsel %vm555_vm7, %v742_v58, %v741_v8  ;;  %v799_v30 = vld [vmem:[%s1995_s10 + $0x20] sm:$0xff]  ;;  %v801_v53 = vld [vmem:[%s1995_s10 + $0x30] sm:$0xff]  ;;  %v802_v58 = vld [vmem:[%s1995_s10 + $0x38] sm:$0xff] }
 0x530   : > { %v804_v8 = vld [vmem:[%s1995_s10 + $0x48] sm:$0xff] }
 0x533   : > { %v701_v36 = vpop.permute.xlu0 %700 }
 0x534   : > { %v719_v26 = vpop.permute.xlu2 %718  ;;  %v736_v40 = vperm.slane %v701_v36, %v1672_v3 }
 0x535   : > { %v745_v6 = vperm.slane %v719_v26, %v1672_v3 }
 0x536   : > { %v737_v61 = vsel %vm555_vm7, %v736_v40, %v735_v42 }
 0x537   : > { %v752_v62 = vsel %vm582_vm10, %v737_v61, %v751_v31  ;;  %v798_v61 = vld [vmem:[%s1995_s10 + $0x18] sm:$0xff]  ;;  %v796_v31 = vld [vmem:[%s1995_s10 + $0x8] sm:$0xff] }
 0x53b   : > { %v707_v25 = vpop.permute.xlu0 %706 }
 0x53c   : > { %v739_v59 = vperm.slane %v707_v25, %v1672_v3  ;;  %v725_v2 = vpop.permute.xlu2 %724 }
 0x53d   : > { %v748_v34 = vperm.slane %v725_v2, %v1672_v3 }
 0x53e   : > { %v740_v7 = vsel %vm555_vm7, %v739_v59, %v738_v47 }
 0x53f   : > { %v753_v4 = vsel %vm584_vm11, %v740_v7, %v752_v62  ;;  %v800_v7 = vld [vmem:[%s1995_s10 + $0x28] sm:$0xff] }
 0x540   : > { %v754_v5 = vsel %vm586_vm12, %v743_v10, %v753_v4 }
 0x543   : > { %v716_v57 = vpop.permute.xlu0 %715 }
 0x544   : > { %v744_v56 = vperm.slane %v716_v57, %v1669_v23 }
 0x546   : > { %v746_v63 = vsel %vm555_vm7, %v745_v6, %v744_v56 }
 0x547   : > { %v755_v17 = vsel %vm588_vm13, %v746_v63, %v754_v5  ;;  %v982_v5 = vld [vmem:[%s1993_s8 + $0x18] sm:$0xff] }
 0x548   : > { %1044 = vmatpush.msrb.mxu0 %v982_v5 }
 0x54b   : > { %v722_v46 = vpop.permute.xlu0 %721 }
 0x54c   : > { %v747_v14 = vperm.slane %v722_v46, %v1669_v23  ;;  %v803_v46 = vld [vmem:[%s1995_s10 + $0x40] sm:$0xff] }
 0x54e   : > { %v749_v1 = vsel %vm555_vm7, %v748_v34, %v747_v14 }
 0x54f   : > { %v756_v18 = vsel %vm590_vm14, %v749_v1, %v755_v17  ;;  %v981_v1 = vld [vmem:[%s1993_s8 + $0x10] sm:$0xff]  ;;  %v990_v17 = vld [vmem:[%s1993_s8 + $0x58] sm:$0xff] }
 0x550   : > { %v758_v19 = vsel %vm593_vm15, %v756_v18, 0.0  ;;  %1016 = vmatpush.msra.mxu3 %v990_v17  ;;  %1045 = vmatpush.msrb.mxu0 %v981_v1  ;;  %v808_v1 = vld [vmem:[%s1995_s10 + $0x68] sm:$0xff] }
 0x551   : > { %759 = vadd.xlane.f32.xlu0 %v758_v19 }
 0x5c4   : > { %v760_v20 = vpop.xlane.xlu0 %759 }
 0x5c5   : > { %1240 = vrcp.f32 %v760_v20  ;;  %v809_v20 = vld [vmem:[%s1995_s10 + $0x70] sm:$0xff] }
 0x5cb   : > { %v1241_v15 = vpop.eup %1240 }
 0x5cc   : > { %v768_v21 = vperm.slane %v1241_v15, 5  ;;  %v763_v22 = vperm.slane %v1241_v15, 0  ;;  %v770_v25 = vperm.slane %v1241_v15, 7  ;;  %v764_v26 = vperm.slane %v1241_v15, 1 }
 0x5cd   : > { %v765_v39 = vperm.slane %v1241_v15, 2 }
 0x5ce   : > { %v789_v3 = vmul.f32 %v1717_v32, %v768_v21  ;;  %v780_v36 = vmul.f32 %v1719_v29, %v763_v22  ;;  %v779_v24 = vmul.f32 %v1722_v55, %v763_v22  ;;  %v794_v27 = vmul.f32 %v1777_v0, %v770_v25 }
 0x5cf   : > { %v782_v28 = vmul.f32 %v1729_v44, %v764_v26  ;;  %v781_v38 = vmul.f32 %v1731_v45, %v764_v26  ;;  %v784_v32 = vmul.f32 %v1738_v50, %v765_v39  ;;  %v783_v29 = vmul.f32 %v1740_v51, %v765_v39  ;;  %v988_v26 = vld [vmem:[%s1993_s8 + $0x48] sm:$0xff] }
 0x5d0   : > { %863 = vperm.xlu0 %1196, %v789_v3   ;;  %818 = vperm.xlu2 %1198, %v780_v36   ;;  %v766_v55 = vperm.slane %v1241_v15, 3  ;;  %v767_v44 = vperm.slane %v1241_v15, 4  ;;  %v769_v50 = vperm.slane %v1241_v15, 6  ;;  %v790_v59 = vmul.f32 %v1766_v52, %v768_v21  ;;  %v989_v21 = vld [vmem:[%s1993_s8 + $0x50] sm:$0xff] }
 0x5d1   : > { %813 = vperm.xlu1 %1197, %v779_v24   ;;  %1017 = vmatpush.msra.mxu3 %v989_v21 }
 0x5d2   : > { %v786_v40 = vmul.f32 %v1747_v33, %v766_v55  ;;  %v785_v54 = vmul.f32 %v1749_v60, %v766_v55  ;;  %v788_v45 = vmul.f32 %v1756_v35, %v767_v44  ;;  %v787_v0 = vmul.f32 %v1758_v37, %v767_v44  ;;  %v1834_v35 = vld [vmem:[%s1146_s27 + $0x8] sm:$0xff]  ;;  %v979_v44 = vld [vmem:[%s1993_s8] sm:$0xff]  ;;  %s1125_s27 = sshll.u32 (%p90_p0), %s1997_s12, 4  ;;  %s1126_s27 = int_to_ptr.hbm [resolvable:$true] %s1125_s27 }
 0x5d3   : > { %v791_v51 = vmul.f32 %v1764_v11, %v769_v50  ;;  %v793_v33 = vmul.f32 %v1771_v16, %v770_v25  ;;  %v792_v60 = vmul.f32 %v1773_v12, %v769_v50  ;;  %v980_v25 = vld [vmem:[%s1993_s8 + $0x8] sm:$0xff]  ;;  %1018 = vmatpush.msra.mxu3 %v988_v26  ;;  %vm1105_vm4 = vcmp.ne.s32.totalorder %v1834_v35, 0 }
 0x5d4   : > { %1046 = vmatpush.msrb.mxu0 %v980_v25 }
 0x5d6   : > { %1047 = vmatpush.msrb.mxu0 %v979_v44 }
 0x5d8   : > { %888 = vperm.xlu0 %1196, %v794_v27   ;;  %828 = vperm.xlu2 %1198, %v782_v28   ;;  %v810_v28 = vld [vmem:[%s1995_s10 + $0x78] sm:$0xff] }
 0x5d9   : > { %823 = vperm.xlu1 %1197, %v781_v38  }
 0x5e0   : > { %838 = vperm.xlu2 %1198, %v784_v32  }
 0x5e1   : > { %833 = vperm.xlu1 %1197, %v783_v29  }
 0x5e8   : > { %848 = vperm.xlu2 %1198, %v786_v40  }
 0x5e9   : > { %843 = vperm.xlu1 %1197, %v785_v54  }
 0x5f0   : > { %858 = vperm.xlu2 %1198, %v788_v45   ;;  %v987_v45 = vld [vmem:[%s1993_s8 + $0x40] sm:$0xff] }
 0x5f1   : > { %853 = vperm.xlu1 %1197, %v787_v0   ;;  %1019 = vmatpush.msra.mxu3 %v987_v45 }
 0x5f8   : > { %873 = vperm.xlu2 %1198, %v791_v51  }
 0x5f9   : > { %868 = vperm.xlu1 %1197, %v790_v59  }
 0x600   : > { %883 = vperm.xlu2 %1198, %v793_v33   ;;  %v805_v33 = vld [vmem:[%s1995_s10 + $0x50] sm:$0xff] }
 0x601   : > { %878 = vperm.xlu1 %1197, %v792_v60  }
 0x609   : > { %1028 = vrot.lane.b32.xlu1 %v1502_v13, %s1284_s26  ;;  %v797_v13 = vld [vmem:[%s1995_s10 + $0x10] sm:$0xff]  ;;  %s1288_s26 = smov (%p90_p0), [#allocation5]  }
 0x60a   :  { %s1123_s4 = sshll.u32 (%p90_p0), %s1288_s26, 4  ;;  %s1124_s4 = int_to_ptr.vmem [resolvable:$true] %s1123_s4 }
 0x611   : > { %1098 = vperm.xlu1 %1197, %v1834_v35  }
 0x62a   : > { %v819_v37 = vpop.permute.xlu2 %818 }
 0x62b   : > { %v892_v10 = vmul.f32 %v819_v37, %v796_v31 }
 0x62d   : > { %v908_v29 = vsel %vm57_vm0, %v892_v10, 0.0 }
 0x632   : > { %v829_v11 = vpop.permute.xlu2 %828 }
 0x633   : > { %v894_v6 = vmul.f32 %v829_v11, %v798_v61  ;;  %v986_v11 = vld [vmem:[%s1993_s8 + $0x38] sm:$0xff] }
 0x634   : > { %1020 = vmatpush.msra.mxu3 %v986_v11 }
 0x635   : > { %v917_v22 = vsel %vm57_vm0, %v894_v6, 0.0 }
 0x63a   : > { %v839_v52 = vpop.permute.xlu2 %838 }
 0x63b   : > { %v896_v63 = vmul.f32 %v839_v52, %v800_v7 }
 0x63d   : > { %v926_v27 = vsel %vm57_vm0, %v896_v63, 0.0 }
 0x642   : > { %v849_v16 = vpop.permute.xlu2 %848  ;;  %v1839_v47 = vpop.permute.xlu0 %863 }
 0x643   : > { %v814_v57 = vpop.permute.xlu1 %813  ;;  %v898_v34 = vmul.f32 %v849_v16, %v802_v58 }
 0x644   : > { %v891_v2 = vmul.f32 %v814_v57, %v795_v49 }
 0x645   : > { %v935_v55 = vsel %vm57_vm0, %v898_v34, 0.0 }
 0x646   : > { %v907_v3 = vsel %vm57_vm0, %v891_v2, 0.0 }
 0x647   : > { %v909_v0 = vadd.f32 %v908_v29, %v907_v3 }
 0x64a   : > { %v859_v12 = vpop.permute.xlu2 %858  ;;  %v889_v38 = vpop.permute.xlu0 %888 }
 0x64b   : > { %v824_v41 = vpop.permute.xlu1 %823  ;;  %v900_v18 = vmul.f32 %v859_v12, %v804_v8  ;;  %v906_v60 = vmul.f32 %v889_v38, %v810_v28  ;;  %v985_v12 = vld [vmem:[%s1993_s8 + $0x30] sm:$0xff] }
 0x64c   : > { %v893_v56 = vmul.f32 %v824_v41, %v797_v13  ;;  %v806_v41 = vld [vmem:[%s1995_s10 + $0x58] sm:$0xff]  ;;  %v910_v13 = vrot.slane %v909_v0, 4  ;;  %1021 = vmatpush.msra.mxu3 %v985_v12 }
 0x64d   : > { %v944_v50 = vsel %vm57_vm0, %v900_v18, 0.0 }
 0x64e   : > { %v916_v14 = vsel %vm57_vm0, %v893_v56, 0.0  ;;  %v911_v6 = vadd.f32 %v910_v13, %v909_v0 }
 0x64f   : > { %v918_v39 = vadd.f32 %v917_v22, %v916_v14 }
 0x650   : > { %v912_v17 = vrot.slane %v911_v6, 2 }
 0x651   : > { %v919_v52 = vrot.slane %v918_v39, 4 }
 0x652   : > { %v1837_v43 = vpop.permute.xlu2 %873  ;;  %v913_v26 = vadd.f32 %v912_v17, %v911_v6  ;;  %v1054_v6 = vld [vmem:[%s1994_s9 + $0x8] sm:$0xff] }
 0x653   : > { %v834_v42 = vpop.permute.xlu1 %833  ;;  %v920_v7 = vadd.f32 %v919_v52, %v918_v39 }
 0x654   : > { %v895_v62 = vmul.f32 %v834_v42, %v799_v30  ;;  %v901_v42 = vmul.f32 %v1839_v47, %v805_v33  ;;  %v983_v47 = vld [vmem:[%s1993_s8 + $0x20] sm:$0xff]  ;;  %v914_v44 = vrot.slane %v913_v26, 1 }
 0x655   : > { %v921_v10 = vrot.slane %v920_v7, 2 }
 0x656   : > { %v925_v19 = vsel %vm57_vm0, %v895_v62, 0.0  ;;  %v952_v62 = vsel %vm57_vm0, %v901_v42, 0.0  ;;  %v915_v52 = vadd.f32 %v914_v44, %v913_v26 }
 0x657   : > { %v927_v40 = vadd.f32 %v926_v27, %v925_v19  ;;  %v922_v22 = vadd.f32 %v921_v10, %v920_v7 }
 0x659   : > { %v928_v57 = vrot.slane %v927_v40, 4  ;;  %v923_v29 = vrot.slane %v922_v22, 1 }
 0x65a   : > { %v884_v15 = vpop.permute.xlu2 %883 }
 0x65b   : > { %v844_v48 = vpop.permute.xlu1 %843  ;;  %v905_v54 = vmul.f32 %v884_v15, %v809_v20  ;;  %v929_v58 = vadd.f32 %v928_v57, %v927_v40 }
 0x65c   : > { %v897_v4 = vmul.f32 %v844_v48, %v801_v53  ;;  %v971_v48 = vsel %vm57_vm0, %v906_v60, 0.0  ;;  %v984_v53 = vld [vmem:[%s1993_s8 + $0x28] sm:$0xff] }
 0x65d   : > { %v970_v16 = vsel %vm57_vm0, %v905_v54, 0.0  ;;  %1022 = vmatpush.msra.mxu3 %v984_v53  ;;  %v930_v14 = vrot.slane %v929_v58, 2 }
 0x65e   : > { %v934_v36 = vsel %vm57_vm0, %v897_v4, 0.0  ;;  %v972_v56 = vadd.f32 %v971_v48, %v970_v16  ;;  %v807_v4 = vld [vmem:[%s1995_s10 + $0x60] sm:$0xff] }
 0x65f   : > { %v936_v51 = vadd.f32 %v935_v55, %v934_v36  ;;  %1023 = vmatpush.msra.mxu3 %v983_v47  ;;  %v903_v18 = vmul.f32 %v1837_v43, %v807_v4  ;;  %v1056_v47 = vld [vmem:[%s1994_s9 + $0x18] sm:$0xff] }
 0x660   : > { %v973_v34 = vrot.slane %v972_v56, 4  ;;  %1072 = vmatpush.msrb.mxu1 %v1056_v47 }
 0x661   : > { %v937_v30 = vrot.slane %v936_v51, 4  ;;  %v961_v27 = vsel %vm57_vm0, %v903_v18, 0.0 }
 0x662   : > { %v974_v3 = vadd.f32 %v973_v34, %v972_v56 }
 0x663   : > { %v854_v24 = vpop.permute.xlu1 %853  ;;  %v938_v2 = vadd.f32 %v937_v30, %v936_v51 }
 0x664   : > { %v899_v32 = vmul.f32 %v854_v24, %v803_v46  ;;  %v931_v24 = vadd.f32 %v930_v14, %v929_v58  ;;  %v975_v55 = vrot.slane %v974_v3, 2 }
 0x665   : > { %v939_v19 = vrot.slane %v938_v2, 2 }
 0x666   : > { %v943_v59 = vsel %vm57_vm0, %v899_v32, 0.0  ;;  %v932_v40 = vrot.slane %v931_v24, 1  ;;  %v976_v33 = vadd.f32 %v975_v55, %v974_v3  ;;  %v1287_v3 = vmov 0.0  }
 0x667   : > { %v945_v37 = vadd.f32 %v944_v50, %v943_v59  ;;  %v940_v28 = vadd.f32 %v939_v19, %v938_v2  ;;  %v924_v59 = vadd.f32 %v923_v29, %v922_v22  ;;  %v1053_v2 = vld [vmem:[%s1994_s9] sm:$0xff] }
 0x668   : > { %v977_v13 = vrot.slane %v976_v33, 1 }
 0x669   : > { %v946_v61 = vrot.slane %v945_v37, 4  ;;  %v941_v45 = vrot.slane %v940_v28, 1  ;;  %v999_v12 = vsel %vm578_vm8, %v924_v59, %v915_v52 }
 0x66a   : > { %v978_v7 = vadd.f32 %v977_v13, %v976_v33 }
 0x66b   : > { %v869_v49 = vpop.permute.xlu1 %868  ;;  %v947_v63 = vadd.f32 %v946_v61, %v945_v37  ;;  %v933_v37 = vadd.f32 %v932_v40, %v931_v24  ;;  %v942_v57 = vadd.f32 %v941_v45, %v940_v28  ;;  %v1104_v24 = vld [vmem:[%s1998_s13] sm:$0xff] }
 0x66c   : > { %v902_v31 = vmul.f32 %v869_v49, %v806_v41 }
 0x66d   : > { %v948_v20 = vrot.slane %v947_v63, 2  ;;  %v1000_v48 = vsel %vm580_vm9, %v933_v37, %v999_v12 }
 0x66e   : > { %v953_v8 = vsel %vm57_vm0, %v902_v31, 0.0  ;;  %v1001_v61 = vsel %vm582_vm10, %v942_v57, %v1000_v48 }
 0x66f   : > { %v954_v46 = vadd.f32 %v953_v8, %v952_v62  ;;  %v949_v39 = vadd.f32 %v948_v20, %v947_v63  ;;  %v1055_v62 = vld [vmem:[%s1994_s9 + $0x10] sm:$0xff] }
 0x670   : > { %1073 = vmatpush.msrb.mxu1 %v1055_v62 }
 0x671   : > { %v955_v5 = vrot.slane %v954_v46, 4  ;;  %v950_v0 = vrot.slane %v949_v39, 1 }
 0x672   : > { %1074 = vmatpush.msrb.mxu1 %v1054_v6 }
 0x673   : > { %v956_v15 = vadd.f32 %v955_v5, %v954_v46  ;;  %v879_v21 = vpop.permute.xlu1 %878  ;;  %v951_v16 = vadd.f32 %v950_v0, %v949_v39 }
 0x674   : > { %v904_v36 = vmul.f32 %v879_v21, %v808_v1  ;;  %1075 = vmatpush.msrb.mxu1 %v1053_v2 }
 0x675   : > { %v957_v25 = vrot.slane %v956_v15, 2  ;;  %v1002_v53 = vsel %vm584_vm11, %v951_v16, %v1001_v61 }
 0x676   : > { %v962_v38 = vsel %vm57_vm0, %v904_v36, 0.0  ;;  %v1164_v36 = vsel %vm1105_vm4, 1.0, %v1287_v3 }
 0x677   : > { %v963_v32 = vadd.f32 %v962_v38, %v961_v27  ;;  %v958_v43 = vadd.f32 %v957_v25, %v956_v15 }
 0x679   : > { %v964_v54 = vrot.slane %v963_v32, 4  ;;  %v959_v60 = vrot.slane %v958_v43, 1 }
 0x67b   : > { %v965_v50 = vadd.f32 %v964_v54, %v963_v32  ;;  %v1029_v51 = vpop.permute.xlu1 %1028  ;;  %v960_v42 = vadd.f32 %v959_v60, %v958_v43 }
 0x67c   : > { %1112 = vst.msk [vmem:[#allocation2] sm:$0xff] %vm81_vm1, %v1029_v51  ;;  %1160 = vmatmul.msk.f32.vlgmr.msrb.gmra.mxu0 %vm81_vm1, %v1029_v51 }
 0x67d   : > { %v966_v11 = vrot.slane %v965_v50, 2  ;;  %v1003_v56 = vsel %vm586_vm12, %v960_v42, %v1002_v53 }
 0x67f   : > { %v967_v41 = vadd.f32 %v966_v11, %v965_v50 }
 0x681   : > { %v968_v30 = vrot.slane %v967_v41, 1 }
 0x683   : > { %v969_v49 = vadd.f32 %v968_v30, %v967_v41  ;;  %v1099_v15 = vpop.permute.xlu1 %1098 }
 0x684   : > { %vm1100_vm3 = vcmp.eq.s32.totalorder %v1669_v23, %v1099_v15 }
 0x685   : > { %v1004_v31 = vsel %vm588_vm13, %v969_v49, %v1003_v56 }
 0x686   : > { %v1005_v58 = vsel %vm590_vm14, %v978_v7, %v1004_v31 }
 0x687   : > { %1159 = vmatmul.msk.f32.vlgmr.msra.gmra.mxu3 %vm57_vm0, %v1005_v58 }
 0x6f9   : > { %v1049_v8 = vpop.f32.mrf.mxu0 }
 0x70a   : > { %v1025_v4 = vpop.f32.mrf.mxu3 }
 0x70b   : > { %v1050_v63 = vadd.f32 %v1049_v8, %v1025_v4 }
 0x70d   : > { %1242 = vtanh.f32 %v1050_v63 }
 0x713   : > { %v1243_v46 = vpop.eup %1242 }
 0x714   : > { %1118 = vst.msk [vmem:[#allocation4] sm:$0xff] %vm81_vm1, %v1243_v46  ;;  %1161 = vmatmul.msk.f32.vlgmr.msrb.gmra.mxu1 %vm81_vm1, %v1243_v46 }
 0x791   : > { %v1077_v10 = vpop.f32.mrf.mxu1 }
 0x792   : > { %1080 = vmax.xlane.f32.xlu2 %v1077_v10 }
 0x7aa   : > { %1114 = vrot.lane.b32.xlu2 %v1495_v9, %s1286_s18 }
 0x805   : > { %v1081_v34 = vpop.xlane.xlu2 %1080 }
 0x806   : > { %v1082_v14 = vsub.f32 %v1077_v10, %v1081_v34 }
 0x808   : > { %v1083_v5 = vmul.f32 1.442695, %v1082_v14 }
 0x80a   : > { %1244 = vpow2.f32 %v1083_v5 }
 0x80d   : > { %v1115_v1 = vpop.permute.xlu2 %1114 }
 0x80e   : > { %1117 = vst.msk [vmem:[#allocation3] sm:$0xff] %vm81_vm1, %v1115_v1 }
 0x810   : > { %v1245_v17 = vpop.eup %1244 }
 0x811   : > { %1085 = vadd.xlane.f32.xlu0 %v1245_v17 }
 0x884   : > { %v1086_v18 = vpop.xlane.xlu0 %1085 }
 0x885   : > { %1246 = vlog2.f32 %v1086_v18 }
 0x88b   : > { %v1247_v19 = vpop.eup %1246 }
 0x88c   : > { %v1088_v20 = vmul.f32 0.6931472, %v1247_v19 }
 0x88e   : > { %v1089_v21 = vadd.f32 %v1088_v20, %v1081_v34 }
 0x890   : > { %v1090_v22 = vsub.f32 %v1077_v10, %v1089_v21 }
 0x892   : > { %1092 = vst [vmem:[%s1091_s19] sm:$0xff] %v1090_v22  ;;  %v1101_v9 = vsel %vm1100_vm3, %v1090_v22, 0.0 }
 0x893   : > { %1102 = vadd.xlane.f32.xlu1 %v1101_v9  ;;  %1131 = dma.vmem_to_hbm [thread:$0]  (%p90_p0), %s1124_s4, 896, %s1126_s27, [#allocation6], %s1289_s28, %s1289_s28, %s1290_s29  }
 0x906   : > { %v1103_v25 = vpop.xlane.xlu1 %1102 }
 0x907   : > { %v1108_v26 = vmul.f32 %v1164_v36, %v1103_v25  ;;  %92 = sbr.rel (!%p90_p0) target bundleno = 153 (0x99), region = 86 }
 0x909   : > { %v1109_v27 = vadd.f32 %v1108_v26, %v1104_v24 }
 0x90b   : > { %1110 = vst.msk [vmem:[%s1998_s13] sm:$0xff] %vm86_vm2, %v1109_v27 }
 0x90c   :  { %1276 = dma.done.wait [#allocation6], 896  }
 0x90d   :  { %1277 = vsyncadd [#allocation6], 4294966400 }
 0x90e   :  { %1140 = vsyncpa [#allocation6], 1 }

</bundles_post_ra>
